<compile_context>
chip_gen: v7x
topology: tpu7x:2x2x1
jax: 0.10.0
libtpu: 0.0.40
codegen_flags: <defaults>
</compile_context>

<pallas_src>
import functools
import math

import jax
import jax.numpy as jnp
import numpy as np
from jax import lax
from jax.experimental import pallas as pl
from jax.experimental.pallas import tpu as pltpu


# --------------------------- tiled matmul (MXU) -----------------------------

def _matmul_kernel(x_ref, w_ref, o_ref, acc_ref):
    @pl.when(pl.program_id(2) == 0)
    def _init():
        acc_ref[...] = jnp.zeros_like(acc_ref)

    acc_ref[...] += jnp.dot(x_ref[...], w_ref[...],
                            preferred_element_type=jnp.float32)

    @pl.when(pl.program_id(2) == pl.num_programs(2) - 1)
    def _store():
        o_ref[...] = acc_ref[...].astype(o_ref.dtype)


def pallas_matmul(x, w, out_dtype=jnp.float32, *, tm=512, tn=512, tk=512):
    """x: (M, K) bf16, w: (K, N) bf16 -> (M, N) out_dtype, f32 accumulation."""
    M, K = x.shape
    K2, N = w.shape
    assert K == K2
    tm, tn, tk = min(tm, M), min(tn, N), min(tk, K)
    assert M % tm == 0 and N % tn == 0 and K % tk == 0, "tile must divide shape"
    grid = (M // tm, N // tn, K // tk)
    return pl.pallas_call(
        _matmul_kernel,
        out_shape=jax.ShapeDtypeStruct((M, N), out_dtype),
        grid=grid,
        in_specs=[pl.BlockSpec((tm, tk), lambda i, j, k: (i, k)),
                  pl.BlockSpec((tk, tn), lambda i, j, k: (k, j))],
        out_specs=pl.BlockSpec((tm, tn), lambda i, j, k: (i, j)),
        scratch_shapes=[pltpu.VMEM((tm, tn), jnp.float32)],
        compiler_params=pltpu.CompilerParams(
            dimension_semantics=("parallel", "parallel", "arbitrary")),
    )(x, w)


# ------------------------------ RoPE helpers ---------------------------------

def _rope_rotate_half(x_f32, cos, sin_signed):
    """RoPE for a head stored in rotate-half order ([even pair slots | odd]).

    cos is the per-pair cos repeated over both halves; sin_signed = [-sin | +sin].
    The half-swap is two static lane slices + concat (cheap, run once per tile).
    """
    half = x_f32.shape[-1] // 2
    swapped = jnp.concatenate([x_f32[..., half:], x_f32[..., :half]], axis=-1)
    return x_f32 * cos + swapped * sin_signed


def _rope_k_kernel(k_ref, cos_ref, sin_ref, o_ref):
    k = k_ref[0].astype(jnp.float32)                       # (ts, Dh)
    o_ref[0] = _rope_rotate_half(k, cos_ref[...], sin_ref[...]).astype(o_ref.dtype)


def pallas_rope_k(qkv, cos_half, sin_half, n_head, n_kv_head, head_dim, *, ts=512):
    """Apply RoPE to the K columns of the fused QKV activation, once.

    qkv: (B, S, (Hq+2*Hkv)*Dh) bf16 with K heads in rotate-half column order.
    Returns (B, S, Hkv*Dh) bf16 rotated keys.
    """
    B, S, _ = qkv.shape
    Hq, Hkv, Dh = n_head, n_kv_head, head_dim
    ts = min(ts, S)
    assert S % ts == 0
    return pl.pallas_call(
        _rope_k_kernel,
        out_shape=jax.ShapeDtypeStruct((B, S, Hkv * Dh), jnp.bfloat16),
        grid=(B, Hkv, S // ts),
        in_specs=[pl.BlockSpec((1, ts, Dh), lambda b, g, si: (b, si, Hq + g)),
                  pl.BlockSpec((ts, Dh), lambda b, g, si: (si, 0)),
                  pl.BlockSpec((ts, Dh), lambda b, g, si: (si, 0))],
        out_specs=pl.BlockSpec((1, ts, Dh), lambda b, g, si: (b, si, g)),
        compiler_params=pltpu.CompilerParams(
            dimension_semantics=("parallel", "parallel", "parallel")),
    )(qkv, cos_half, sin_half)


# ----------------------- flash attention (causal, GQA) -----------------------

def _flash_attn_kernel(qi_tbl, ki_tbl, q_ref, k_ref, v_ref, cos_q_ref, sin_q_ref,
                       o_ref, q_scr, m_scr, l_scr, acc_scr,
                       *, tq, tkv, rep, head_dim):
    Dh = head_dim
    step = pl.program_id(2)
    qi = qi_tbl[step]
    ki = ki_tbl[step]
    last_ki = (qi * tq + tq - 1) // tkv     # last KV tile intersecting causal region

    @pl.when(ki == 0)
    def _init():
        m_scr[...] = jnp.full(m_scr.shape, -jnp.inf, jnp.float32)
        l_scr[...] = jnp.zeros(l_scr.shape, jnp.float32)
        acc_scr[...] = jnp.zeros(acc_scr.shape, jnp.float32)
        # rotate (and implicitly scaled via the pre-scaled wqkv) Q once per q-tile
        cos = cos_q_ref[...]
        sin = sin_q_ref[...]
        for h in range(rep):
            qh = q_ref[0, :, h * Dh:(h + 1) * Dh].astype(jnp.float32)
            q_scr[h] = _rope_rotate_half(qh, cos, sin).astype(jnp.bfloat16)

    # Every grid step in the flattened pair table is causally relevant: no skip.
    k = k_ref[0]                                           # (tkv, Dh) bf16, RoPE'd
    v = v_ref[0]                                           # (tkv, Dh) bf16
    row = qi * tq + lax.broadcasted_iota(jnp.int32, (tq, tkv), 0)
    col = ki * tkv + lax.broadcasted_iota(jnp.int32, (tq, tkv), 1)
    causal_ok = col <= row

    for h in range(rep):
        s = lax.dot_general(q_scr[h], k, (((1,), (1,)), ((), ())),
                            preferred_element_type=jnp.float32)   # (tq, tkv)
        s = jnp.where(causal_ok, s, -1e30)
        m_prev = m_scr[h]
        m_new = jnp.maximum(m_prev, jnp.max(s, axis=-1, keepdims=True))
        alpha = jnp.exp(m_prev - m_new)
        p = jnp.exp(s - m_new)
        l_scr[h] = alpha * l_scr[h] + jnp.sum(p, axis=-1, keepdims=True)
        acc_scr[h] = alpha * acc_scr[h] + jnp.dot(
            p.astype(jnp.bfloat16), v, preferred_element_type=jnp.float32)
        m_scr[h] = m_new

    @pl.when(ki == last_ki)
    def _finalize():
        for h in range(rep):
            o_ref[0, :, h * Dh:(h + 1) * Dh] = (
                acc_scr[h] / l_scr[h]).astype(o_ref.dtype)


def pallas_flash_attention(qkv, k_rot, cos_half, sin_half, n_head, n_kv_head,
                           head_dim, *, tq=256, tkv=512):
    """Causal flash attention with GQA over KV heads.

    qkv:   (B, S, (Hq+2*Hkv)*Dh) bf16, Q/K head columns in rotate-half order,
           Q columns pre-scaled by 1/sqrt(Dh).
    k_rot: (B, S, Hkv*Dh) bf16, RoPE already applied.
    Returns (B, S, Hq*Dh) bf16 attention output (original head_dim layout; V
    is untouched by the permutation), ready for the wo projection.
    """
    B, S, total = qkv.shape
    Hq, Hkv, Dh = n_head, n_kv_head, head_dim
    assert total == (Hq + 2 * Hkv) * Dh
    rep = Hq // Hkv
    tq, tkv = min(tq, S), min(tkv, S)
    assert S % tq == 0 and S % tkv == 0, "seq tile must divide seqlen"
    nq = S // tq

    # Enumerate only the lower-triangular (qi, ki) tile pairs (causal region).
    qi_list, ki_list = [], []
    for qi in range(nq):
        last = (qi * tq + tq - 1) // tkv
        for ki in range(last + 1):
            qi_list.append(qi)
            ki_list.append(ki)
    qi_tbl = jnp.asarray(qi_list, jnp.int32)
    ki_tbl = jnp.asarray(ki_list, jnp.int32)
    n_pairs = len(qi_list)

    kernel = functools.partial(_flash_attn_kernel, tq=tq, tkv=tkv,
                               rep=rep, head_dim=Dh)

    grid_spec = pltpu.PrefetchScalarGridSpec(
        num_scalar_prefetch=2,
        grid=(B, Hkv, n_pairs),
        in_specs=[
            # all rep query heads of KV group g, query tile qi
            pl.BlockSpec((1, tq, rep * Dh),
                         lambda b, g, s, qi, ki: (b, qi[s], g)),
            # RoPE'd K for group g, kv tile ki
            pl.BlockSpec((1, tkv, Dh),
                         lambda b, g, s, qi, ki: (b, ki[s], g)),
            # V for group g, kv tile ki (from the fused qkv buffer)
            pl.BlockSpec((1, tkv, Dh),
                         lambda b, g, s, qi, ki: (b, ki[s], Hq + Hkv + g)),
            # cos/sin for the query rows (fetched only when qi changes)
            pl.BlockSpec((tq, Dh), lambda b, g, s, qi, ki: (qi[s], 0)),
            pl.BlockSpec((tq, Dh), lambda b, g, s, qi, ki: (qi[s], 0)),
        ],
        out_specs=pl.BlockSpec((1, tq, rep * Dh),
                               lambda b, g, s, qi, ki: (b, qi[s], g)),
        scratch_shapes=[
            pltpu.VMEM((rep, tq, Dh), jnp.bfloat16),   # rotated Q (per q-tile)
            pltpu.VMEM((rep, tq, 1), jnp.float32),     # running max m
            pltpu.VMEM((rep, tq, 1), jnp.float32),     # running sum l
            pltpu.VMEM((rep, tq, Dh), jnp.float32),    # output accumulator
        ],
    )

    return pl.pallas_call(
        kernel,
        out_shape=jax.ShapeDtypeStruct((B, S, Hq * Dh), jnp.bfloat16),
        grid_spec=grid_spec,
        compiler_params=pltpu.CompilerParams(
            dimension_semantics=("parallel", "parallel", "arbitrary")),
    )(qi_tbl, ki_tbl, qkv, k_rot, qkv, cos_half, sin_half)


# --------------------------- weight pre-processing ---------------------------

def _qk_half_permutation(n_head, n_kv_head, head_dim, total_dim):
    """Column permutation putting each Q/K head into rotate-half order."""
    within = np.concatenate([np.arange(0, head_dim, 2),    # even pair slots
                             np.arange(1, head_dim, 2)])   # odd pair slots
    parts = [h * head_dim + within for h in range(n_head + n_kv_head)]
    v_start = (n_head + n_kv_head) * head_dim
    parts.append(np.arange(v_start, total_dim))            # V untouched
    return np.concatenate(parts)


def prepare_attention_weights(wqkv, wo, n_head, n_kv_head):
    """One-time: transpose to (K,N), rotate-half permute Q/K columns,
    fold 1/sqrt(head_dim) into the Q columns, cast to bf16."""
    total, dim = wqkv.shape
    head_dim = dim // n_head
    perm = _qk_half_permutation(n_head, n_kv_head, head_dim, total)
    wqkv_t = jnp.asarray(wqkv, jnp.float32).T[:, perm]               # (dim, total)
    col_scale = np.ones((total,), np.float32)
    col_scale[: n_head * head_dim] = 1.0 / math.sqrt(head_dim)       # Q columns
    wqkv_t = (wqkv_t * col_scale[None, :]).astype(jnp.bfloat16)
    wo_t = jnp.asarray(wo, jnp.float32).T.astype(jnp.bfloat16)       # (dim, dim)
    return wqkv_t, wo_t


# ------------------------------ forward glue ---------------------------------

def attention_forward(x, wqkv_t, wo_t, freqs_cis, n_head, n_kv_head,
                      *, attn_tq=256, attn_tkv=512):
    """Equivalent of Attention.forward(x, freqs_cis) in eval mode (causal prefill)."""
    B, S, dim = x.shape
    head_dim = dim // n_head
    total = wqkv_t.shape[1]

    if x.dtype != jnp.bfloat16:
        x = x.astype(jnp.bfloat16)   # keep x bf16 upstream to avoid this pass

    # fused QKV projection (1/sqrt(Dh) already folded into the Q weight columns)
    qkv = pallas_matmul(x.reshape(B * S, dim), wqkv_t,
                        out_dtype=jnp.bfloat16).reshape(B, S, total)

    # rotary tables in rotate-half layout: (S, Dh)
    cos = freqs_cis[..., 0].astype(jnp.float32)          # (S, Dh/2)
    sin = freqs_cis[..., 1].astype(jnp.float32)
    cos_half = jnp.concatenate([cos, cos], axis=-1)      # (S, Dh)
    sin_half = jnp.concatenate([-sin, sin], axis=-1)

    # RoPE applied to K exactly once (tiny elementwise kernel)
    k_rot = pallas_rope_k(qkv, cos_half, sin_half, n_head, n_kv_head, head_dim)

    # causal flash attention (GQA, pair-table grid, in-kernel Q RoPE hoisted)
    attn = pallas_flash_attention(qkv, k_rot, cos_half, sin_half,
                                  n_head, n_kv_head, head_dim,
                                  tq=attn_tq, tkv=attn_tkv)   # (B, S, dim) bf16

    # output projection; attn_dropout / resid_dropout are identity in eval mode
    out = pallas_matmul(attn.reshape(B * S, dim), wo_t, out_dtype=jnp.float32)
    # TODO(synk): kv_cache decode path (input_pos / explicit mask) not implemented.
    return out.reshape(B, S, dim)


# ------------------------------ JAX reference ---------------------------------

def _apply_rotary_emb_ref(x, freqs_cis):
    B, S, H, D = x.shape
    xs = x.reshape(B, S, H, D // 2, 2)
    fc = freqs_cis.reshape(1, S, 1, D // 2, 2)
    r = jnp.stack([xs[..., 0] * fc[..., 0] - xs[..., 1] * fc[..., 1],
                   xs[..., 1] * fc[..., 0] + xs[..., 0] * fc[..., 1]], axis=-1)
    return r.reshape(B, S, H, D)


def reference_forward(x, wqkv, wo, freqs_cis, n_head, n_kv_head):
    hp = lax.Precision.HIGHEST
    B, S, dim = x.shape
    head_dim = dim // n_head
    kv_size = n_kv_head * head_dim
    qkv = jnp.dot(x, wqkv.T, precision=hp)
    xq = qkv[..., :dim].reshape(B, S, n_head, head_dim)
    xk = qkv[..., dim:dim + kv_size].reshape(B, S, n_kv_head, head_dim)
    xv = qkv[..., dim + kv_size:].reshape(B, S, n_kv_head, head_dim)
    xq = _apply_rotary_emb_ref(xq, freqs_cis)
    xk = _apply_rotary_emb_ref(xk, freqs_cis)
    q = jnp.transpose(xq, (0, 2, 1, 3))
    k = jnp.transpose(xk, (0, 2, 1, 3))
    v = jnp.transpose(xv, (0, 2, 1, 3))
    rep = n_head // n_kv_head
    k = jnp.repeat(k, rep, axis=1)
    v = jnp.repeat(v, rep, axis=1)
    s = jnp.einsum("bhqd,bhkd->bhqk", q, k, precision=hp) / math.sqrt(head_dim)
    mask = jnp.tril(jnp.ones((S, S), bool))
    s = jnp.where(mask, s, -jnp.inf)
    p = jax.nn.softmax(s, axis=-1)
    o = jnp.einsum("bhqk,bhkd->bhqd", p, v, precision=hp)
    o = jnp.transpose(o, (0, 2, 1, 3)).reshape(B, S, dim)
    return jnp.dot(o, wo.T, precision=hp)


# ---------------------------------- main --------------------------------------

if __name__ == "__main__":
    # GQA config (rep=2, two KV groups), head_dim=128, multiple KV tiles.
    B, S = 2, 256
    n_head, n_kv_head = 4, 2
    head_dim = 128
    dim = n_head * head_dim                              # 512
    total_kv_dim = (n_head + 2 * n_kv_head) * head_dim   # 1024

    key = jax.random.PRNGKey(0)
    kx, kq, ko = jax.random.split(key, 3)
    x = jax.random.normal(kx, (B, S, dim), jnp.float32).astype(jnp.bfloat16)
    wqkv = 0.02 * jax.random.normal(kq, (total_kv_dim, dim), jnp.float32)
    wo = 0.02 * jax.random.normal(ko, (dim, dim), jnp.float32)

    # rotary tables: freqs_cis[t, i] = (cos(t*w_i), sin(t*w_i)), base=10000
    half = head_dim // 2
    inv_freq = 1.0 / (10000.0 ** (jnp.arange(0, half, dtype=jnp.float32) * 2.0
                                  / head_dim))
    t = jnp.arange(S, dtype=jnp.float32)
    ang = jnp.outer(t, inv_freq)
    freqs_cis = jnp.stack([jnp.cos(ang), jnp.sin(ang)], axis=-1)   # (S, half, 2)

    # one-time weight preprocessing
    wqkv_t, wo_t = prepare_attention_weights(wqkv, wo, n_head, n_kv_head)

    # small attention tiles here so the causal pair table / online-softmax
    # accumulation over several KV tiles is exercised at test shapes;
    # production defaults are tq=256, tkv=512.
    out = attention_forward(x, wqkv_t, wo_t, freqs_cis, n_head, n_kv_head,
                            attn_tq=128, attn_tkv=128)
    out = jax.block_until_ready(out)

    ref = reference_forward(x.astype(jnp.float32), wqkv, wo, freqs_cis,
                            n_head, n_kv_head)
    # bf16 MXU operands with f32 accumulation -> bf16-level tolerances
    np.testing.assert_allclose(np.asarray(out), np.asarray(ref),
                               rtol=2.5e-2, atol=1e-2)
    print("KERNEL_OK")
</pallas_src>

<mosaic_0001>
module attributes {stable_mosaic.version = 11 : i64} {
  func.func @_matmul_kernel(%arg0: i32, %arg1: i32, %arg2: i32, %arg3: memref<512x512xbf16, #tpu.memory_space<vmem>>, %arg4: memref<512x512xbf16, #tpu.memory_space<vmem>>, %arg5: memref<512x512xbf16, #tpu.memory_space<vmem>>, %arg6: memref<512x512xf32, #tpu.memory_space<vmem>>) attributes {dimension_semantics = [#tpu.dimension_semantics<parallel>, #tpu.dimension_semantics<parallel>, #tpu.dimension_semantics<arbitrary>], iteration_bounds = array<i64: 1, 2, 1>, scalar_prefetch = 0 : i64, scratch_operands = 1 : i64, tpu.core_type = #tpu.core_type<tc>, window_params = [{transform_indices = @transform_0, window_bounds = array<i64: 512, 512>}, {transform_indices = @transform_1, window_bounds = array<i64: 512, 512>}, {transform_indices = @transform_2, window_bounds = array<i64: 512, 512>}]} {
    %c0_i32 = arith.constant 0 : i32
    %0 = arith.cmpi eq, %arg2, %c0_i32 : i32
    %1 = arith.extui %0 : i1 to i32
    %c0_i32_0 = arith.constant 0 : i32
    %2 = arith.cmpi ne, %1, %c0_i32_0 : i32
    scf.if %2 {
      %cst_10 = arith.constant 0.000000e+00 : f32
      %12 = vector.broadcast %cst_10 : f32 to vector<512x512xf32>
      %c0_11 = arith.constant 0 : index
      %c0_12 = arith.constant 0 : index
      %13 = vector.load %arg6[%c0_11, %c0_12] : memref<512x512xf32, #tpu.memory_space<vmem>>, vector<512x512xf32>
      tpu.vector_store %arg6[%c0_11, %c0_12], %12 {strides = array<i32>} : memref<512x512xf32, #tpu.memory_space<vmem>>, vector<512x512xf32>,
    } else {
    }
    %c0 = arith.constant 0 : index
    %c0_1 = arith.constant 0 : index
    %3 = vector.load %arg6[%c0, %c0_1] : memref<512x512xf32, #tpu.memory_space<vmem>>, vector<512x512xf32>
    %c0_2 = arith.constant 0 : index
    %c0_3 = arith.constant 0 : index
    %4 = vector.load %arg3[%c0_2, %c0_3] : memref<512x512xbf16, #tpu.memory_space<vmem>>, vector<512x512xbf16>
    %c0_4 = arith.constant 0 : index
    %c0_5 = arith.constant 0 : index
    %5 = vector.load %arg4[%c0_4, %c0_5] : memref<512x512xbf16, #tpu.memory_space<vmem>>, vector<512x512xbf16>
    %cst = arith.constant dense<0.000000e+00> : vector<512x512xf32>
    %6 = tpu.matmul %4, %5, %cst {dimension_numbers = #tpu.dot_dimension_numbers<[1], [0], [0], [1], [0, 0, 1, 1], [], []>} : vector<512x512xbf16>, vector<512x512xbf16>, vector<512x512xf32> -> vector<512x512xf32>
    %7 = arith.addf %3, %6 : vector<512x512xf32>
    %c0_6 = arith.constant 0 : index
    %c0_7 = arith.constant 0 : index
    %8 = vector.load %arg6[%c0_6, %c0_7] : memref<512x512xf32, #tpu.memory_space<vmem>>, vector<512x512xf32>
    tpu.vector_store %arg6[%c0_6, %c0_7], %7 {strides = array<i32>} : memref<512x512xf32, #tpu.memory_space<vmem>>, vector<512x512xf32>,
    %c0_i32_8 = arith.constant 0 : i32
    %9 = arith.cmpi eq, %arg2, %c0_i32_8 : i32
    %10 = arith.extui %9 : i1 to i32
    %c0_i32_9 = arith.constant 0 : i32
    %11 = arith.cmpi ne, %10, %c0_i32_9 : i32
    scf.if %11 {
      %c0_10 = arith.constant 0 : index
      %c0_11 = arith.constant 0 : index
      %12 = vector.load %arg6[%c0_10, %c0_11] : memref<512x512xf32, #tpu.memory_space<vmem>>, vector<512x512xf32>
      %13 = arith.truncf %12 : vector<512x512xf32> to vector<512x512xbf16>
      %c0_12 = arith.constant 0 : index
      %c0_13 = arith.constant 0 : index
      %14 = vector.load %arg5[%c0_12, %c0_13] : memref<512x512xbf16, #tpu.memory_space<vmem>>, vector<512x512xbf16>
      tpu.vector_store %arg5[%c0_12, %c0_13], %13 {strides = array<i32>} : memref<512x512xbf16, #tpu.memory_space<vmem>>, vector<512x512xbf16>,
    } else {
    }
    return
  }
  func.func @transform_0(%arg0: i32, %arg1: i32, %arg2: i32) -> (i32, i32) {
    %c0_i32 = arith.constant 0 : i32
    return %arg0, %arg2 : i32, i32
  }
  func.func @transform_1(%arg0: i32, %arg1: i32, %arg2: i32) -> (i32, i32) {
    %c0_i32 = arith.constant 0 : i32
    return %arg2, %arg1 : i32, i32
  }
  func.func @transform_2(%arg0: i32, %arg1: i32, %arg2: i32) -> (i32, i32) {
    %c0_i32 = arith.constant 0 : i32
    return %arg0, %arg1 : i32, i32
  }
}

</mosaic_0001>

<bundles_post_ra>
// kernel: tpu_custom_call.1
= control target key start
LH: loop header
LB: loop body
LE: loop exit
PB: predicated region body
PF: predicated region fallthrough
CT: control target
= control target key end

     0   :  { %7 = vsyncpa [#allocation4], 0  ;;  %s7387_s0 = inlined_call_operand.hbm [shape: bf16[512,512], index: 0, kind: input, shape index: {}]   ;;  %s7388_s1 = inlined_call_operand.hbm [shape: bf16[512,1024], index: 1, kind: input, shape index: {}]   ;;  %s7389_s2 = inlined_call_operand.hbm [shape: bf16[512,1024], index: 2, kind: output, shape index: {}]  }
   0x1   :  { %8 = vsyncpa [#allocation7], 0 }
   0x2   :  { %10 = vsyncpa [#allocation7 + $0x1], 0 }
   0x3   :  { %11 = vsyncpa [#allocation5], 0 }
   0x4   :  { %13 = vsyncpa [#allocation5 + $0x1], 0  ;;  %s6897_s9 = smov 0   ;;  %s6899_s10 = smov 0  }
   0x5   :  { %s6901_s11 = smov 0   ;;  %s6903_s12 = smov 0  }
   0x6   :  { %s6905_s13 = smov 0   ;;  %s6907_s14 = smov 0  }
   0x7 LB: > { %s5477_s15 = sadd.s32 4294967295, %s6871_s14   ;;  %s5478_s16 = sadd.s32 4294967294, %s6871_s14   ;;  %s6871_s14 = sphi %s6907_s14, %s19_s14   ;;  %s6867_s13 = sphi %s6905_s13, %s7415_s13   ;;  %s6863_s12 = sphi %s6903_s12, %s7414_s12   ;;  %s6859_s11 = sphi %s6901_s11, %s7413_s11   ;;  %s6855_s10 = sphi %s6899_s10, %s7412_s10   ;;  %s6851_s9 = sphi %s6897_s9, %s7411_s9  }
   0x8   : > { %p82_p0 = scmp.ne.s32.totalorder %s6859_s11, %s6855_s10  ;;  %p83_p1 = scmp.eq.s32.totalorder %s6871_s14, 0 }
   0x9   : > { %p88_p2 = scmp.ne.s32.totalorder %s6855_s10, %s6851_s9  ;;  %p6934_p3 = scmp.eq.s32.totalorder %s5477_s15, 0 }
   0xa   : > { %p6938_p4 = por %p83_p1, %p82_p0  ;;  %p114_p5 = scmp.eq.s32.totalorder %s5477_s15, 1 }
   0xb   : > { %s7396_s17 = scalar_select %p6934_p3, 1, 0 }
   0xc   : > { %p6944_p6 = por %p6934_p3, %p88_p2  ;;  %p120_p7 = scmp.eq.s32.totalorder %s5478_s16, 1 }
   0xd   : > { %p6948_p8 = por %p114_p5, %p82_p0  ;;  %p5479_p9 = scmp.ge.s32.totalorder %s6871_s14, 1 }
   0xe   : > { %s7398_s19 = scalar_select %p6944_p6, 1, 0 }
   0xf   : > { %s7399_s20 = scalar_select %p6948_p8, 1, 0 }
  0x10   : > { %p6953_p10 = por %p120_p7, %p88_p2  ;;  %p127_p11 = scmp.lt.s32.totalorder %s6871_s14, 3 }
  0x11   : > { %s6873_s23 = smov [#allocation3]   ;;  %p6285_p1 = scmp.lt.s32.totalorder %s6871_s14, 2 }
  0x12   : > { %s7400_s21 = scalar_select %p6953_p10, 1, 0 }
  0x13   : > { %p6958_p12 = pnand %p5479_p9, %p127_p11  ;;  %s145_s24 = sshll.u32 %s6873_s23, 4  ;;  %s6962_s24 = int_to_ptr.vmem [resolvable:$true] %s145_s24 }
  0x14   : > { %p6976_p2 = pnand %p6285_p1, %p6938_p4  ;;  %s34_s27 = sadd.s32 1, %s6867_s13 }
  0x15   : > { %s7401_s22 = scalar_select %p6958_p12, 1, 0 }
  0x16   : > { %p6272_p13 = pneg %p6958_p12  ;;  %s6727_s30 = scalar_lea.hbm %s7387_s0, 16384 }
  0x17   : > { %s7403_s26 = scalar_select %p6976_p2, 1, 0 }
  0x18   : > { %p6970_p5 = pnand %p6272_p13, %p6934_p3  ;;  %p6728_p7 = scmp.ne.s32.totalorder %s7387_s0, %s6727_s30 }
  0x19   : > { %p6734_p4 = scmp.lt.u32.totalorder %s6727_s30, %s7387_s0 }
  0x1a   : > { %p6729_p9 = pneg %p6970_p5 }
  0x1c   : > { %p6730_p11 = pnand %p6729_p9, %p6728_p7 }
  0x1e   : > { %p6731_p13 = pneg %p6730_p11 }
  0x20   : > { %p6736_p1 = pnand %p6734_p4, %p6731_p13 }
  0x22   : > { %6739 = shalt.err (!%p6736_p1)
}
  0x23   : > { %s6740_s7 = scalar_lea.vmem %s6962_s24, 16384  ;;  %p6748_p6 = scmp.lt.s32.totalorder %s6962_s24, %s6962_s24 }
  0x24   : > { %p6741_p0 = scmp.ne.s32.totalorder %s6962_s24, %s6740_s7  ;;  %p6749_p3 = scmp.lt.s32.totalorder %s6740_s7, %s6740_s7 }
  0x26   : > { %p6743_p10 = pnand %p6741_p0, %p6729_p9  ;;  %p6750_p12 = por %p6749_p3, %p6748_p6 }
  0x28   : > { %p6744_p8 = pneg %p6743_p10 }
  0x2a   : > { %p6751_p2 = pnand %p6750_p12, %p6744_p8 }
  0x2c   : > { %6754 = shalt.err (!%p6751_p2)
}
  0x2d   : > { %s6874_s8 = smov 256   ;;  %s6875_s15 = smov 16  }
  0x2e   : > { %6275 = dma.hbm_to_vmem [thread:$0]  (!%p6970_p5), %s7387_s0, 16384, %s6962_s24, [#allocation4], %s6874_s8, %s6874_s8, %s6875_s15  }
  0x2f   : > { %p36_p3 = scmp.ge.s32.totalorder %s34_s27, 2  ;;  %s75_s23 = sadd.s32 1, %s6859_s11 }
  0x30   : > { %s159_s28 = sand.u32 1, %s6859_s11   ;;  %s5878_s3 = sshll.u32 %s6867_s13, 8 }
  0x31   : > { %s7417_s27 = smov (%p36_p3, %s34_s27), 0  ;;  %s5482_s29 = sshll.u32 %s159_s28, 10 }
  0x32   : > { %s71_s30 = ssub.s32 %s6867_s13, %s7417_s27  ;;  %s7015_s5 = scalar_lea.hbm %s7388_s1, %s5878_s3 }
  0x33   : > { %p73_p6 = scmp.eq.s32.totalorder %s71_s30, 0  ;;  %s163_s24 = scalar_lea.vmem [#allocation6], %s5482_s29 }
  0x34   : > { %s173_s6 = sshll.u32 %s163_s24, 4  ;;  %s7022_s16 = scalar_lea.sflag [#allocation7], %s159_s28  ;;  %s7020_s6 = int_to_ptr.vmem [resolvable:$true] %s173_s6 }
  0x35   : > { %s7018_s7 = scalar_select %p73_p6, %s6859_s11, %s75_s23  }
  0x36   : > { %s6755_s18 = scalar_lea.hbm %s7015_s5, 16384  ;;  %p7404_p10 = scmp.ne.s32.totalorder %s7403_s26, 0 }
  0x37   : > { %p6756_p8 = scmp.ne.s32.totalorder %s7015_s5, %s6755_s18  ;;  %s6760_s25 = scalar_lea.hbm %s7388_s1, 32768 }
  0x38   : > { %p6757_p12 = pneg %p7404_p10  ;;  %p6761_p2 = scmp.lt.u32.totalorder %s7015_s5, %s7388_s1 }
  0x39   : > { %p6762_p7 = scmp.lt.u32.totalorder %s6760_s25, %s6755_s18  ;;  %p6764_p11 = scmp.lt.u32.totalorder %s6755_s18, %s7015_s5 }
  0x3a   : > { %p6758_p0 = pnand %p6757_p12, %p6756_p8 }
  0x3b   : > { %p6763_p9 = por %p6762_p7, %p6761_p2 }
  0x3c   : > { %p6759_p5 = pneg %p6758_p0 }
  0x3d   : > { %p6765_p13 = por %p6764_p11, %p6763_p9 }
  0x3f   : > { %p6766_p4 = pnand %p6765_p13, %p6759_p5 }
  0x41   : > { %6769 = shalt.err (!%p6766_p4)
}
  0x42   : > { %s6770_s23 = scalar_lea.vmem %s7020_s6, 16384  ;;  %s6876_s28 = smov [#allocation6]  }
  0x43   : > { %p6771_p1 = scmp.ne.s32.totalorder %s7020_s6, %s6770_s23  ;;  %s6775_s24 = sshll.u32 %s6876_s28, 4  ;;  %s6776_s24 = int_to_ptr.vmem [resolvable:$false] %s6775_s24 }
  0x44   : > { %s6777_s30 = scalar_lea.vmem %s6776_s24, 32768  ;;  %p6778_p8 = scmp.lt.s32.totalorder %s7020_s6, %s6776_s24 }
  0x45   : > { %p6773_p3 = pnand %p6771_p1, %p6757_p12  ;;  %p6779_p0 = scmp.lt.s32.totalorder %s6777_s30, %s6770_s23 }
  0x47   : > { %p6774_p6 = pneg %p6773_p3  ;;  %p6780_p2 = por %p6779_p0, %p6778_p8 }
  0x49   : > { %p6781_p7 = pnand %p6780_p2, %p6774_p6 }
  0x4b   : > { %6784 = shalt.err (!%p6781_p7)
}
  0x4c   : > { %s6877_s18 = smov 512   ;;  %p7405_p12 = scmp.ne.s32.totalorder %s7401_s22, 0 }
  0x4d   : > { %6279 = dma.hbm_to_vmem [thread:$0]  (!%p7404_p10), %s7015_s5, 16384, %s7020_s6, %s7022_s16, %s6877_s18, %s6874_s8, %s6875_s15  }
  0x4e   : > { %185 = sbr.rel (%p7405_p12) target bundleno = 892 (0x37c), region = 28  ;;  %p7406_p5 = scmp.ne.s32.totalorder (!%p7405_p12), %s7396_s17, 0 }
  0x55   : > { %6838 = dma.done.wait (%p7406_p5), [#allocation4], 16384  }
  0x56   : > { %6840 = vsyncadd (%p7406_p5), [#allocation4], 4294950912  ;;  %s7059_s3 = sand.u32 1, %s6855_s10   ;;  %p7407_p10 = scmp.ne.s32.totalorder %s7398_s19, 0 }
  0x57   : > { %s5487_s26 = sshll.u32 %s7059_s3, 10  ;;  %s192_s25 = scalar_lea.sflag [#allocation7], %s7059_s3 }
  0x58   : > { %s7065_s8 = scalar_lea.vmem [#allocation6], %s5487_s26 }
  0x59   : > { %6842 = dma.done.wait (%p7407_p10), %s192_s25, 16384  }
  0x5a   : > { %6844 = vsyncadd (%p7407_p10), %s192_s25, 4294950912  ;;  %v6343_v0 = vld [vmem:[%s7065_s8 + $0x4] ss:$16 sps:$4 sm:$0xff]   ;;  %v6345_v1 = vld [vmem:[%s7065_s8 + $0xc] ss:$16 sps:$4 sm:$0xff]   ;;  %s7201_s17 = scalar_lea.vmem [#allocation8], %s5487_s26 }
  0x5b   : > { %2274 = vmatprep.subr.bf16.mxu0 %v6343_v0  ;;  %v6347_v2 = vld [vmem:[%s7065_s8] ss:$16 sps:$4 sm:$0xff]   ;;  %v6348_v3 = vld [vmem:[%s7065_s8 + $0x8] ss:$16 sps:$4 sm:$0xff]   ;;  %2980 = vmatprep.subr.bf16.mxu1 %v6345_v1  ;;  %v6349_v4 = vld [vmem:[%s7065_s8 + $0x24] ss:$16 sps:$4 sm:$0xff]  }
  0x5c   : > { %2275 = vmatpush1.bf16.msra.mxu0 %v6347_v2  ;;  %2981 = vmatpush1.bf16.msra.mxu1 %v6348_v3  ;;  %v6351_v5 = vld [vmem:[%s7065_s8 + $0x2c] ss:$16 sps:$4 sm:$0xff]   ;;  %v6353_v6 = vld [vmem:[%s7065_s8 + $0x20] ss:$16 sps:$4 sm:$0xff]   ;;  %v6354_v7 = vld [vmem:[%s7065_s8 + $0x28] ss:$16 sps:$4 sm:$0xff]  }
  0x5d   : > { %2276 = vmatprep.subr.bf16.mxu0 %v6349_v4  ;;  %2982 = vmatprep.subr.bf16.mxu1 %v6351_v5  ;;  %v6355_v8 = vld [vmem:[%s7065_s8 + $0x44] ss:$16 sps:$4 sm:$0xff]   ;;  %v6357_v9 = vld [vmem:[%s7065_s8 + $0x4c] ss:$16 sps:$4 sm:$0xff]   ;;  %v6359_v10 = vld [vmem:[%s7065_s8 + $0x40] ss:$16 sps:$4 sm:$0xff]  }
  0x5e   : > { %v6360_v11 = vld [vmem:[%s7065_s8 + $0x48] ss:$16 sps:$4 sm:$0xff]   ;;  %v6361_v12 = vld [vmem:[%s7065_s8 + $0x64] ss:$16 sps:$4 sm:$0xff]   ;;  %v6363_v13 = vld [vmem:[%s7065_s8 + $0x6c] ss:$16 sps:$4 sm:$0xff]  }
  0x5f   : > { %v6365_v14 = vld [vmem:[%s7065_s8 + $0x60] ss:$16 sps:$4 sm:$0xff]   ;;  %v6366_v15 = vld [vmem:[%s7065_s8 + $0x68] ss:$16 sps:$4 sm:$0xff]   ;;  %v6367_v16 = vld [vmem:[%s7065_s8 + $0x84] ss:$16 sps:$4 sm:$0xff]  }
  0x60   : > { %2277 = vmatpush1.bf16.msra.mxu0 %v6353_v6  ;;  %2983 = vmatpush1.bf16.msra.mxu1 %v6354_v7  ;;  %v6369_v17 = vld [vmem:[%s7065_s8 + $0x8c] ss:$16 sps:$4 sm:$0xff]   ;;  %v6371_v18 = vld [vmem:[%s7065_s8 + $0x80] ss:$16 sps:$4 sm:$0xff]   ;;  %v6372_v19 = vld [vmem:[%s7065_s8 + $0x88] ss:$16 sps:$4 sm:$0xff]  }
  0x61   : > { %2278 = vmatprep.subr.bf16.mxu0 %v6355_v8  ;;  %2984 = vmatprep.subr.bf16.mxu1 %v6357_v9  ;;  %v6373_v20 = vld [vmem:[%s7065_s8 + $0xa4] ss:$16 sps:$4 sm:$0xff]   ;;  %v6375_v21 = vld [vmem:[%s7065_s8 + $0xac] ss:$16 sps:$4 sm:$0xff]   ;;  %v6377_v22 = vld [vmem:[%s7065_s8 + $0xa0] ss:$16 sps:$4 sm:$0xff]  }
  0x62   : > { %v6378_v23 = vld [vmem:[%s7065_s8 + $0xa8] ss:$16 sps:$4 sm:$0xff]   ;;  %v6379_v24 = vld [vmem:[%s7065_s8 + $0xc4] ss:$16 sps:$4 sm:$0xff]   ;;  %v6381_v25 = vld [vmem:[%s7065_s8 + $0xcc] ss:$16 sps:$4 sm:$0xff]  }
  0x63   : > { %v6383_v26 = vld [vmem:[%s7065_s8 + $0xc0] ss:$16 sps:$4 sm:$0xff]   ;;  %v6384_v27 = vld [vmem:[%s7065_s8 + $0xc8] ss:$16 sps:$4 sm:$0xff]   ;;  %v6385_v28 = vld [vmem:[%s7065_s8 + $0xe4] ss:$16 sps:$4 sm:$0xff]  }
  0x64   : > { %2279 = vmatpush1.bf16.msra.mxu0 %v6359_v10  ;;  %2985 = vmatpush1.bf16.msra.mxu1 %v6360_v11  ;;  %v6387_v29 = vld [vmem:[%s7065_s8 + $0xec] ss:$16 sps:$4 sm:$0xff]   ;;  %v6389_v30 = vld [vmem:[%s7065_s8 + $0xe0] ss:$16 sps:$4 sm:$0xff]   ;;  %v6390_v31 = vld [vmem:[%s7065_s8 + $0xe8] ss:$16 sps:$4 sm:$0xff]  }
  0x65   : > { %2280 = vmatprep.subr.bf16.mxu0 %v6361_v12  ;;  %2986 = vmatprep.subr.bf16.mxu1 %v6363_v13  ;;  %v6391_v32 = vld [vmem:[%s7065_s8 + $0x104] ss:$16 sps:$4 sm:$0xff]   ;;  %v6393_v33 = vld [vmem:[%s7065_s8 + $0x10c] ss:$16 sps:$4 sm:$0xff]   ;;  %v6395_v34 = vld [vmem:[%s7065_s8 + $0x100] ss:$16 sps:$4 sm:$0xff]  }
  0x66   : > { %v6396_v35 = vld [vmem:[%s7065_s8 + $0x108] ss:$16 sps:$4 sm:$0xff]   ;;  %v6397_v36 = vld [vmem:[%s7065_s8 + $0x124] ss:$16 sps:$4 sm:$0xff]   ;;  %v6399_v37 = vld [vmem:[%s7065_s8 + $0x12c] ss:$16 sps:$4 sm:$0xff]  }
  0x67   : > { %v6401_v38 = vld [vmem:[%s7065_s8 + $0x120] ss:$16 sps:$4 sm:$0xff]   ;;  %v6402_v39 = vld [vmem:[%s7065_s8 + $0x128] ss:$16 sps:$4 sm:$0xff]   ;;  %v6403_v40 = vld [vmem:[%s7065_s8 + $0x144] ss:$16 sps:$4 sm:$0xff]  }
  0x68   : > { %2281 = vmatpush1.bf16.msra.mxu0 %v6365_v14  ;;  %2987 = vmatpush1.bf16.msra.mxu1 %v6366_v15  ;;  %v6405_v41 = vld [vmem:[%s7065_s8 + $0x14c] ss:$16 sps:$4 sm:$0xff]   ;;  %v6407_v42 = vld [vmem:[%s7065_s8 + $0x140] ss:$16 sps:$4 sm:$0xff]   ;;  %v6408_v43 = vld [vmem:[%s7065_s8 + $0x148] ss:$16 sps:$4 sm:$0xff]  }
  0x69   : > { %2282 = vmatprep.subr.bf16.mxu0 %v6367_v16  ;;  %2988 = vmatprep.subr.bf16.mxu1 %v6369_v17  ;;  %v6409_v44 = vld [vmem:[%s7065_s8 + $0x164] ss:$16 sps:$4 sm:$0xff]   ;;  %v6411_v45 = vld [vmem:[%s7065_s8 + $0x16c] ss:$16 sps:$4 sm:$0xff]   ;;  %v6413_v46 = vld [vmem:[%s7065_s8 + $0x160] ss:$16 sps:$4 sm:$0xff]  }
  0x6a   : > { %v6414_v47 = vld [vmem:[%s7065_s8 + $0x168] ss:$16 sps:$4 sm:$0xff]   ;;  %v6441_v48 = vld [vmem:[#allocation3 + $0x4] ss:$16 sps:$4 sm:$0xff]   ;;  %v6417_v50 = vld [vmem:[%s7065_s8 + $0x18c] ss:$16 sps:$4 sm:$0xff]  }
  0x6b   : > { %v6415_v49 = vld [vmem:[%s7065_s8 + $0x184] ss:$16 sps:$4 sm:$0xff]   ;;  %2306 = vmatprep.mubr.bf16.mxu0 %v6441_v48  ;;  %3012 = vmatprep.mubr.bf16.mxu1 %v6441_v48  ;;  %v6419_v51 = vld [vmem:[%s7065_s8 + $0x180] ss:$16 sps:$4 sm:$0xff]   ;;  %v6420_v52 = vld [vmem:[%s7065_s8 + $0x188] ss:$16 sps:$4 sm:$0xff]  }
  0x6c   : > { %2283 = vmatpush1.bf16.msra.mxu0 %v6371_v18  ;;  %2989 = vmatpush1.bf16.msra.mxu1 %v6372_v19  ;;  %v6421_v53 = vld [vmem:[%s7065_s8 + $0x1a4] ss:$16 sps:$4 sm:$0xff]   ;;  %v6423_v54 = vld [vmem:[%s7065_s8 + $0x1ac] ss:$16 sps:$4 sm:$0xff]   ;;  %v6425_v55 = vld [vmem:[%s7065_s8 + $0x1a0] ss:$16 sps:$4 sm:$0xff]  }
  0x6d   : > { %2284 = vmatprep.subr.bf16.mxu0 %v6373_v20  ;;  %2990 = vmatprep.subr.bf16.mxu1 %v6375_v21  ;;  %v6426_v56 = vld [vmem:[%s7065_s8 + $0x1a8] ss:$16 sps:$4 sm:$0xff]   ;;  %v6427_v57 = vld [vmem:[%s7065_s8 + $0x1c4] ss:$16 sps:$4 sm:$0xff]   ;;  %v6429_v58 = vld [vmem:[%s7065_s8 + $0x1cc] ss:$16 sps:$4 sm:$0xff]  }
  0x6e   : > { %v6431_v59 = vld [vmem:[%s7065_s8 + $0x1c0] ss:$16 sps:$4 sm:$0xff]   ;;  %v6432_v60 = vld [vmem:[%s7065_s8 + $0x1c8] ss:$16 sps:$4 sm:$0xff]   ;;  %v6433_v61 = vld [vmem:[%s7065_s8 + $0x1e4] ss:$16 sps:$4 sm:$0xff]  }
  0x6f   : > { %v6435_v62 = vld [vmem:[%s7065_s8 + $0x1ec] ss:$16 sps:$4 sm:$0xff]   ;;  %v6437_v63 = vld [vmem:[%s7065_s8 + $0x1e0] ss:$16 sps:$4 sm:$0xff]   ;;  %v6438_v0 = vld [vmem:[%s7065_s8 + $0x1e8] ss:$16 sps:$4 sm:$0xff]  }
  0x70   : > { %2285 = vmatpush1.bf16.msra.mxu0 %v6377_v22  ;;  %2991 = vmatpush1.bf16.msra.mxu1 %v6378_v23  ;;  %v6444_v1 = vld [vmem:[%s7065_s8 + $0x204] ss:$16 sps:$4 sm:$0xff]   ;;  %v6447_v2 = vld [vmem:[%s7065_s8 + $0x20c] ss:$16 sps:$4 sm:$0xff]   ;;  %v6439_v3 = vld [vmem:[#allocation3] ss:$16 sps:$4 sm:$0xff]  }
  0x71   : > { %2286 = vmatprep.subr.bf16.mxu0 %v6379_v24  ;;  %2992 = vmatprep.subr.bf16.mxu1 %v6381_v25  ;;  %v6442_v4 = vld [vmem:[%s7065_s8 + $0x200] ss:$16 sps:$4 sm:$0xff]   ;;  %v6445_v5 = vld [vmem:[%s7065_s8 + $0x208] ss:$16 sps:$4 sm:$0xff]   ;;  %v6448_v6 = vld [vmem:[#allocation3 + $0x24] ss:$16 sps:$4 sm:$0xff]  }
  0x72   : > { %v6456_v7 = vld [vmem:[%s7065_s8 + $0x224] ss:$16 sps:$4 sm:$0xff]   ;;  %v6459_v8 = vld [vmem:[%s7065_s8 + $0x22c] ss:$16 sps:$4 sm:$0xff]   ;;  %v6454_v9 = vld [vmem:[%s7065_s8 + $0x220] ss:$16 sps:$4 sm:$0xff]  }
  0x73   : > { %v6457_v10 = vld [vmem:[%s7065_s8 + $0x228] ss:$16 sps:$4 sm:$0xff]   ;;  %v6468_v11 = vld [vmem:[%s7065_s8 + $0x244] ss:$16 sps:$4 sm:$0xff]   ;;  %v6471_v12 = vld [vmem:[%s7065_s8 + $0x24c] ss:$16 sps:$4 sm:$0xff]  }
  0x74   : > { %2287 = vmatpush1.bf16.msra.mxu0 %v6383_v26  ;;  %2993 = vmatpush1.bf16.msra.mxu1 %v6384_v27  ;;  %v6450_v13 = vld [vmem:[#allocation3 + $0x20] ss:$16 sps:$4 sm:$0xff]   ;;  %v6451_v14 = vld [vmem:[#allocation3 + $0x44] ss:$16 sps:$4 sm:$0xff]   ;;  %v6469_v16 = vld [vmem:[%s7065_s8 + $0x248] ss:$16 sps:$4 sm:$0xff]  }
  0x75   : > { %2288 = vmatprep.subr.bf16.mxu0 %v6385_v28  ;;  %2994 = vmatprep.subr.bf16.mxu1 %v6387_v29  ;;  %v6466_v15 = vld [vmem:[%s7065_s8 + $0x240] ss:$16 sps:$4 sm:$0xff]   ;;  %v6480_v17 = vld [vmem:[%s7065_s8 + $0x264] ss:$16 sps:$4 sm:$0xff]   ;;  %v6483_v18 = vld [vmem:[%s7065_s8 + $0x26c] ss:$16 sps:$4 sm:$0xff]  }
  0x76   : > { %v6478_v19 = vld [vmem:[%s7065_s8 + $0x260] ss:$16 sps:$4 sm:$0xff]   ;;  %v6481_v20 = vld [vmem:[%s7065_s8 + $0x268] ss:$16 sps:$4 sm:$0xff]   ;;  %v6492_v21 = vld [vmem:[%s7065_s8 + $0x284] ss:$16 sps:$4 sm:$0xff]  }
  0x77   : > { %v6495_v22 = vld [vmem:[%s7065_s8 + $0x28c] ss:$16 sps:$4 sm:$0xff]   ;;  %v6453_v23 = vld [vmem:[#allocation3 + $0x40] ss:$16 sps:$4 sm:$0xff]   ;;  %v6460_v24 = vld [vmem:[#allocation3 + $0x64] ss:$16 sps:$4 sm:$0xff]  }
  0x78   : > { %2289 = vmatpush1.bf16.msra.mxu0 %v6389_v30  ;;  %2995 = vmatpush1.bf16.msra.mxu1 %v6390_v31  ;;  %v6490_v25 = vld [vmem:[%s7065_s8 + $0x280] ss:$16 sps:$4 sm:$0xff]   ;;  %v6493_v26 = vld [vmem:[%s7065_s8 + $0x288] ss:$16 sps:$4 sm:$0xff]   ;;  %v6504_v27 = vld [vmem:[%s7065_s8 + $0x2a4] ss:$16 sps:$4 sm:$0xff]  }
  0x79   : > { %2290 = vmatprep.subr.bf16.mxu0 %v6391_v32  ;;  %2996 = vmatprep.subr.bf16.mxu1 %v6393_v33  ;;  %v6507_v28 = vld [vmem:[%s7065_s8 + $0x2ac] ss:$16 sps:$4 sm:$0xff]   ;;  %v6502_v29 = vld [vmem:[%s7065_s8 + $0x2a0] ss:$16 sps:$4 sm:$0xff]   ;;  %v6505_v30 = vld [vmem:[%s7065_s8 + $0x2a8] ss:$16 sps:$4 sm:$0xff]  }
  0x7a   : > { %v6516_v31 = vld [vmem:[%s7065_s8 + $0x2c4] ss:$16 sps:$4 sm:$0xff]   ;;  %v6519_v32 = vld [vmem:[%s7065_s8 + $0x2cc] ss:$16 sps:$4 sm:$0xff]   ;;  %v6462_v33 = vld [vmem:[#allocation3 + $0x60] ss:$16 sps:$4 sm:$0xff]  }
  0x7b   : > { %v6555_v48 = vld [vmem:[%s7065_s8 + $0x32c] ss:$16 sps:$4 sm:$0xff]   ;;  %s6007_s19 = sshll.u32 %s6863_s12, 8  ;;  %s5370_s22 = sshll.u32 %s7201_s17, 4  ;;  %s7334_s22 = int_to_ptr.vmem [resolvable:$true] %s5370_s22 }
  0x7c   : > { %2291 = vmatpush1.bf16.msra.mxu0 %v6395_v34  ;;  %2997 = vmatpush1.bf16.msra.mxu1 %v6396_v35  ;;  %v6463_v34 = vld [vmem:[#allocation3 + $0x84] ss:$16 sps:$4 sm:$0xff]   ;;  %v6514_v35 = vld [vmem:[%s7065_s8 + $0x2c0] ss:$16 sps:$4 sm:$0xff]   ;;  %s7332_s6 = scalar_lea.hbm %s7389_s2, %s6007_s19  ;;  %s5354_s12 = scalar_lea.sflag [#allocation5], %s7059_s3 }
  0x7d   : > { %2292 = vmatprep.subr.bf16.mxu0 %v6397_v36  ;;  %2998 = vmatprep.subr.bf16.mxu1 %v6399_v37  ;;  %v6517_v36 = vld [vmem:[%s7065_s8 + $0x2c8] ss:$16 sps:$4 sm:$0xff]   ;;  %v6528_v37 = vld [vmem:[%s7065_s8 + $0x2e4] ss:$16 sps:$4 sm:$0xff]   ;;  %s6785_s16 = scalar_lea.vmem %s7334_s22, 16384  ;;  %p7408_p11 = scmp.ne.s32.totalorder %s7399_s20, 0 }
  0x7e   : > { %p6786_p9 = scmp.ne.s32.totalorder %s7334_s22, %s6785_s16  ;;  %s6878_s29 = smov [#allocation8]  }
  0x7f   : > { %s6789_s4 = sshll.u32 %s6878_s29, 4  ;;  %s6790_s4 = int_to_ptr.vmem [resolvable:$false] %s6789_s4 }
  0x80   : > { %2293 = vmatpush1.bf16.msra.mxu0 %v6401_v38  ;;  %2999 = vmatpush1.bf16.msra.mxu1 %v6402_v39  ;;  %v6531_v38 = vld [vmem:[%s7065_s8 + $0x2ec] ss:$16 sps:$4 sm:$0xff]   ;;  %v6526_v39 = vld [vmem:[%s7065_s8 + $0x2e0] ss:$16 sps:$4 sm:$0xff]   ;;  %p6787_p13 = pnand %p6786_p9, %p7408_p11  ;;  %s6791_s23 = scalar_lea.vmem %s6790_s4, 32768 }
  0x81   : > { %2294 = vmatprep.subr.bf16.mxu0 %v6403_v40  ;;  %3000 = vmatprep.subr.bf16.mxu1 %v6405_v41  ;;  %v6465_v40 = vld [vmem:[#allocation3 + $0x80] ss:$16 sps:$4 sm:$0xff]   ;;  %v6529_v41 = vld [vmem:[%s7065_s8 + $0x2e8] ss:$16 sps:$4 sm:$0xff]   ;;  %p6792_p1 = scmp.lt.s32.totalorder %s7334_s22, %s6790_s4  ;;  %p6793_p3 = scmp.lt.s32.totalorder %s6791_s23, %s6785_s16 }
  0x82   : > { %p6788_p4 = pneg %p6787_p13 }
  0x83   : > { %p6794_p6 = por %p6793_p3, %p6792_p1 }
  0x84   : > { %2295 = vmatpush1.bf16.msra.mxu0 %v6407_v42  ;;  %3001 = vmatpush1.bf16.msra.mxu1 %v6408_v43  ;;  %v6472_v42 = vld [vmem:[#allocation3 + $0xa4] ss:$16 sps:$4 sm:$0xff]  }
  0x85   : > { %2296 = vmatprep.subr.bf16.mxu0 %v6409_v44  ;;  %3002 = vmatprep.subr.bf16.mxu1 %v6411_v45  ;;  %v6540_v43 = vld [vmem:[%s7065_s8 + $0x304] ss:$16 sps:$4 sm:$0xff]   ;;  %v6543_v44 = vld [vmem:[%s7065_s8 + $0x30c] ss:$16 sps:$4 sm:$0xff]   ;;  %v6538_v45 = vld [vmem:[%s7065_s8 + $0x300] ss:$16 sps:$4 sm:$0xff]   ;;  %p6795_p8 = pnand %p6794_p6, %p6788_p4 }
  0x88   : > { %2297 = vmatpush1.bf16.msra.mxu0 %v6413_v46  ;;  %3003 = vmatpush1.bf16.msra.mxu1 %v6414_v47  ;;  %v6541_v46 = vld [vmem:[%s7065_s8 + $0x308] ss:$16 sps:$4 sm:$0xff]   ;;  %v6552_v47 = vld [vmem:[%s7065_s8 + $0x324] ss:$16 sps:$4 sm:$0xff]  }
  0x89   : > { %2298 = vmatprep.subr.bf16.mxu0 %v6415_v49  ;;  %3004 = vmatprep.subr.bf16.mxu1 %v6417_v50  ;;  %v6550_v49 = vld [vmem:[%s7065_s8 + $0x320] ss:$16 sps:$4 sm:$0xff]   ;;  %v6553_v50 = vld [vmem:[%s7065_s8 + $0x328] ss:$16 sps:$4 sm:$0xff]  }
  0x8c   : > { %2299 = vmatpush1.bf16.msra.mxu0 %v6419_v51  ;;  %3005 = vmatpush1.bf16.msra.mxu1 %v6420_v52  ;;  %v6564_v51 = vld [vmem:[%s7065_s8 + $0x344] ss:$16 sps:$4 sm:$0xff]   ;;  %v6474_v52 = vld [vmem:[#allocation3 + $0xa0] ss:$16 sps:$4 sm:$0xff]  }
  0x8d   : > { %2300 = vmatprep.subr.bf16.mxu0 %v6421_v53  ;;  %3006 = vmatprep.subr.bf16.mxu1 %v6423_v54  ;;  %v6567_v53 = vld [vmem:[%s7065_s8 + $0x34c] ss:$16 sps:$4 sm:$0xff]   ;;  %v6475_v54 = vld [vmem:[#allocation3 + $0xc4] ss:$16 sps:$4 sm:$0xff]  }
  0x90   : > { %2301 = vmatpush1.bf16.msra.mxu0 %v6425_v55  ;;  %3007 = vmatpush1.bf16.msra.mxu1 %v6426_v56  ;;  %v6562_v55 = vld [vmem:[%s7065_s8 + $0x340] ss:$16 sps:$4 sm:$0xff]   ;;  %v6565_v56 = vld [vmem:[%s7065_s8 + $0x348] ss:$16 sps:$4 sm:$0xff]  }
  0x91   : > { %2302 = vmatprep.subr.bf16.mxu0 %v6427_v57  ;;  %3008 = vmatprep.subr.bf16.mxu1 %v6429_v58  ;;  %v6477_v57 = vld [vmem:[#allocation3 + $0xc0] ss:$16 sps:$4 sm:$0xff]   ;;  %v6484_v58 = vld [vmem:[#allocation3 + $0xe4] ss:$16 sps:$4 sm:$0xff]  }
  0x94   : > { %2303 = vmatpush1.bf16.msra.mxu0 %v6431_v59  ;;  %3009 = vmatpush1.bf16.msra.mxu1 %v6432_v60  ;;  %v6574_v59 = vld [vmem:[%s7065_s8 + $0x360] ss:$16 sps:$4 sm:$0xff]   ;;  %v6576_v60 = vld [vmem:[%s7065_s8 + $0x364] ss:$16 sps:$4 sm:$0xff]  }
  0x95   : > { %2304 = vmatprep.subr.bf16.mxu0 %v6433_v61  ;;  %3010 = vmatprep.subr.bf16.mxu1 %v6435_v62  ;;  %v6577_v61 = vld [vmem:[%s7065_s8 + $0x368] ss:$16 sps:$4 sm:$0xff]   ;;  %v6579_v62 = vld [vmem:[%s7065_s8 + $0x36c] ss:$16 sps:$4 sm:$0xff]  }
  0x98   : > { %2305 = vmatpush1.bf16.msra.mxu0 %v6437_v63  ;;  %3011 = vmatpush1.bf16.msra.mxu1 %v6438_v0  ;;  %v6486_v63 = vld [vmem:[#allocation3 + $0xe0] ss:$16 sps:$4 sm:$0xff]   ;;  %v6487_v0 = vld [vmem:[#allocation3 + $0x104] ss:$16 sps:$4 sm:$0xff]  }
  0x99   : > { %2627 = vmatprep.subr.bf16.mxu0 %v6444_v1  ;;  %3333 = vmatprep.subr.bf16.mxu1 %v6447_v2  ;;  %v6489_v1 = vld [vmem:[#allocation3 + $0x100] ss:$16 sps:$4 sm:$0xff]   ;;  %v6496_v2 = vld [vmem:[#allocation3 + $0x124] ss:$16 sps:$4 sm:$0xff]  }
  0x9b   : > { %2307 = vmatmul.mubr.bf16.vlgmr.msra.gmra.mrb[0].mxu0 %v6439_v3  ;;  %3013 = vmatmul.mubr.bf16.vlgmr.msra.gmra.mrb[0].mxu1 %v6439_v3  ;;  %v6586_v3 = vld [vmem:[%s7065_s8 + $0x380] ss:$16 sps:$4 sm:$0xff]  }
  0x9c   : > { %2628 = vmatpush1.bf16.msra.mxu0 %v6442_v4  ;;  %3334 = vmatpush1.bf16.msra.mxu1 %v6445_v5  ;;  %v6588_v4 = vld [vmem:[%s7065_s8 + $0x384] ss:$16 sps:$4 sm:$0xff]   ;;  %v6589_v5 = vld [vmem:[%s7065_s8 + $0x388] ss:$16 sps:$4 sm:$0xff]  }
  0x9d   : > { %2316 = vmatprep.mubr.bf16.mxu0 %v6448_v6  ;;  %3022 = vmatprep.mubr.bf16.mxu1 %v6448_v6  ;;  %v6591_v6 = vld [vmem:[%s7065_s8 + $0x38c] ss:$16 sps:$4 sm:$0xff]  }
  0x9e   : > { %2629 = vmatprep.subr.bf16.mxu0 %v6456_v7  ;;  %3335 = vmatprep.subr.bf16.mxu1 %v6459_v8  ;;  %v6498_v7 = vld [vmem:[#allocation3 + $0x120] ss:$16 sps:$4 sm:$0xff]   ;;  %v6499_v8 = vld [vmem:[#allocation3 + $0x144] ss:$16 sps:$4 sm:$0xff]  }
  0xa0   : > { %2630 = vmatpush1.bf16.msra.mxu0 %v6454_v9  ;;  %3336 = vmatpush1.bf16.msra.mxu1 %v6457_v10  ;;  %v6501_v9 = vld [vmem:[#allocation3 + $0x140] ss:$16 sps:$4 sm:$0xff]   ;;  %v6508_v10 = vld [vmem:[#allocation3 + $0x164] ss:$16 sps:$4 sm:$0xff]  }
  0xa1   : > { %2631 = vmatprep.subr.bf16.mxu0 %v6468_v11  ;;  %3337 = vmatprep.subr.bf16.mxu1 %v6471_v12  ;;  %v6598_v11 = vld [vmem:[%s7065_s8 + $0x3a0] ss:$16 sps:$4 sm:$0xff]   ;;  %v6600_v12 = vld [vmem:[%s7065_s8 + $0x3a4] ss:$16 sps:$4 sm:$0xff]  }
  0xa3   : > { %2317 = vmatmul.mubr.bf16.gmra.mrb[4].mxu0 %v6450_v13  ;;  %3023 = vmatmul.mubr.bf16.gmra.mrb[4].mxu1 %v6450_v13  ;;  %v6601_v13 = vld [vmem:[%s7065_s8 + $0x3a8] ss:$16 sps:$4 sm:$0xff]  }
  0xa4   : > { %2326 = vmatprep.mubr.bf16.mxu0 %v6451_v14  ;;  %3032 = vmatprep.mubr.bf16.mxu1 %v6451_v14  ;;  %v6603_v14 = vld [vmem:[%s7065_s8 + $0x3ac] ss:$16 sps:$4 sm:$0xff]  }
  0xa5   : > { %2632 = vmatpush1.bf16.msra.mxu0 %v6466_v15  ;;  %3338 = vmatpush1.bf16.msra.mxu1 %v6469_v16  ;;  %v6510_v15 = vld [vmem:[#allocation3 + $0x160] ss:$16 sps:$4 sm:$0xff]   ;;  %v6511_v16 = vld [vmem:[#allocation3 + $0x184] ss:$16 sps:$4 sm:$0xff]  }
  0xa6   : > { %2633 = vmatprep.subr.bf16.mxu0 %v6480_v17  ;;  %3339 = vmatprep.subr.bf16.mxu1 %v6483_v18  ;;  %v6513_v17 = vld [vmem:[#allocation3 + $0x180] ss:$16 sps:$4 sm:$0xff]   ;;  %v6520_v18 = vld [vmem:[#allocation3 + $0x1a4] ss:$16 sps:$4 sm:$0xff]  }
  0xa9   : > { %2634 = vmatpush1.bf16.msra.mxu0 %v6478_v19  ;;  %3340 = vmatpush1.bf16.msra.mxu1 %v6481_v20  ;;  %v6610_v19 = vld [vmem:[%s7065_s8 + $0x3c0] ss:$16 sps:$4 sm:$0xff]   ;;  %v6612_v20 = vld [vmem:[%s7065_s8 + $0x3c4] ss:$16 sps:$4 sm:$0xff]  }
  0xaa   : > { %2635 = vmatprep.subr.bf16.mxu0 %v6492_v21  ;;  %3341 = vmatprep.subr.bf16.mxu1 %v6495_v22  ;;  %v6613_v21 = vld [vmem:[%s7065_s8 + $0x3c8] ss:$16 sps:$4 sm:$0xff]   ;;  %v6615_v22 = vld [vmem:[%s7065_s8 + $0x3cc] ss:$16 sps:$4 sm:$0xff]  }
  0xab   : > { %2327 = vmatmul.mubr.bf16.gmra.mrb[8].mxu0 %v6453_v23  ;;  %3033 = vmatmul.mubr.bf16.gmra.mrb[8].mxu1 %v6453_v23  ;;  %v6522_v23 = vld [vmem:[#allocation3 + $0x1a0] ss:$16 sps:$4 sm:$0xff]  }
  0xac   : > { %2336 = vmatprep.mubr.bf16.mxu0 %v6460_v24  ;;  %3042 = vmatprep.mubr.bf16.mxu1 %v6460_v24  ;;  %v6523_v24 = vld [vmem:[#allocation3 + $0x1c4] ss:$16 sps:$4 sm:$0xff]  }
  0xad   : > { %2636 = vmatpush1.bf16.msra.mxu0 %v6490_v25  ;;  %3342 = vmatpush1.bf16.msra.mxu1 %v6493_v26  ;;  %v6525_v25 = vld [vmem:[#allocation3 + $0x1c0] ss:$16 sps:$4 sm:$0xff]   ;;  %v6532_v26 = vld [vmem:[#allocation3 + $0x1e4] ss:$16 sps:$4 sm:$0xff]  }
  0xae   : > { %2637 = vmatprep.subr.bf16.mxu0 %v6504_v27  ;;  %3343 = vmatprep.subr.bf16.mxu1 %v6507_v28  ;;  %v6622_v27 = vld [vmem:[%s7065_s8 + $0x3e0] ss:$16 sps:$4 sm:$0xff]   ;;  %v6624_v28 = vld [vmem:[%s7065_s8 + $0x3e4] ss:$16 sps:$4 sm:$0xff]  }
  0xb1   : > { %2638 = vmatpush1.bf16.msra.mxu0 %v6502_v29  ;;  %3344 = vmatpush1.bf16.msra.mxu1 %v6505_v30  ;;  %v6625_v29 = vld [vmem:[%s7065_s8 + $0x3e8] ss:$16 sps:$4 sm:$0xff]   ;;  %v6627_v30 = vld [vmem:[%s7065_s8 + $0x3ec] ss:$16 sps:$4 sm:$0xff]  }
  0xb2   : > { %2639 = vmatprep.subr.bf16.mxu0 %v6516_v31  ;;  %3345 = vmatprep.subr.bf16.mxu1 %v6519_v32  ;;  %v6534_v31 = vld [vmem:[#allocation3 + $0x1e0] ss:$16 sps:$4 sm:$0xff]   ;;  %v6535_v32 = vld [vmem:[#allocation3 + $0x204] ss:$16 sps:$4 sm:$0xff]  }
  0xb3   : > { %2337 = vmatmul.mubr.bf16.gmra.mrb[12].mxu0 %v6462_v33  ;;  %3043 = vmatmul.mubr.bf16.gmra.mrb[12].mxu1 %v6462_v33  ;;  %v6537_v33 = vld [vmem:[#allocation3 + $0x200] ss:$16 sps:$4 sm:$0xff]  }
  0xb4   : > { %2346 = vmatprep.mubr.bf16.mxu0 %v6463_v34  ;;  %3052 = vmatprep.mubr.bf16.mxu1 %v6463_v34  ;;  %v6544_v34 = vld [vmem:[#allocation3 + $0x224] ss:$16 sps:$4 sm:$0xff]  }
  0xb5   : > { %2640 = vmatpush1.bf16.msra.mxu0 %v6514_v35  ;;  %3346 = vmatpush1.bf16.msra.mxu1 %v6517_v36  ;;  %v6546_v35 = vld [vmem:[#allocation3 + $0x220] ss:$16 sps:$4 sm:$0xff]   ;;  %v6547_v36 = vld [vmem:[#allocation3 + $0x244] ss:$16 sps:$4 sm:$0xff]  }
  0xb6   : > { %2641 = vmatprep.subr.bf16.mxu0 %v6528_v37  ;;  %3347 = vmatprep.subr.bf16.mxu1 %v6531_v38  ;;  %v6549_v37 = vld [vmem:[#allocation3 + $0x240] ss:$16 sps:$4 sm:$0xff]   ;;  %v6556_v38 = vld [vmem:[#allocation3 + $0x264] ss:$16 sps:$4 sm:$0xff]  }
  0xb9   : > { %2642 = vmatpush1.bf16.msra.mxu0 %v6526_v39  ;;  %3348 = vmatpush1.bf16.msra.mxu1 %v6529_v41  ;;  %v6558_v39 = vld [vmem:[#allocation3 + $0x260] ss:$16 sps:$4 sm:$0xff]  }
  0xba   : > { %2643 = vmatprep.subr.bf16.mxu0 %v6540_v43  ;;  %3349 = vmatprep.subr.bf16.mxu1 %v6543_v44  ;;  %v6561_v41 = vld [vmem:[#allocation3 + $0x280] ss:$16 sps:$4 sm:$0xff]   ;;  %v6571_v44 = vld [vmem:[#allocation3 + $0x2c4] ss:$16 sps:$4 sm:$0xff]  }
  0xbb   : > { %2347 = vmatmul.mubr.bf16.gmra.mrb[16].mxu0 %v6465_v40  ;;  %3053 = vmatmul.mubr.bf16.gmra.mrb[16].mxu1 %v6465_v40  ;;  %v6559_v40 = vld [vmem:[#allocation3 + $0x284] ss:$16 sps:$4 sm:$0xff]   ;;  %v6570_v43 = vld [vmem:[#allocation3 + $0x2a0] ss:$16 sps:$4 sm:$0xff]  }
  0xbc   : > { %2356 = vmatprep.mubr.bf16.mxu0 %v6472_v42  ;;  %3062 = vmatprep.mubr.bf16.mxu1 %v6472_v42  ;;  %v6568_v42 = vld [vmem:[#allocation3 + $0x2a4] ss:$16 sps:$4 sm:$0xff]  }
  0xbd   : > { %2644 = vmatpush1.bf16.msra.mxu0 %v6538_v45  ;;  %3350 = vmatpush1.bf16.msra.mxu1 %v6541_v46  ;;  %v6573_v45 = vld [vmem:[#allocation3 + $0x2c0] ss:$16 sps:$4 sm:$0xff]   ;;  %v6580_v46 = vld [vmem:[#allocation3 + $0x2e4] ss:$16 sps:$4 sm:$0xff]  }
  0xbe   : > { %2645 = vmatprep.subr.bf16.mxu0 %v6552_v47  ;;  %3351 = vmatprep.subr.bf16.mxu1 %v6555_v48  ;;  %v6582_v47 = vld [vmem:[#allocation3 + $0x2e0] ss:$16 sps:$4 sm:$0xff]   ;;  %v6583_v48 = vld [vmem:[#allocation3 + $0x304] ss:$16 sps:$4 sm:$0xff]  }
  0xc1   : > { %2646 = vmatpush1.bf16.msra.mxu0 %v6550_v49  ;;  %3352 = vmatpush1.bf16.msra.mxu1 %v6553_v50  ;;  %v6585_v49 = vld [vmem:[#allocation3 + $0x300] ss:$16 sps:$4 sm:$0xff]   ;;  %v6592_v50 = vld [vmem:[#allocation3 + $0x324] ss:$16 sps:$4 sm:$0xff]  }
  0xc2   : > { %2647 = vmatprep.subr.bf16.mxu0 %v6564_v51  ;;  %3353 = vmatprep.subr.bf16.mxu1 %v6567_v53  ;;  %v6594_v51 = vld [vmem:[#allocation3 + $0x320] ss:$16 sps:$4 sm:$0xff]  }
  0xc3   : > { %2357 = vmatmul.mubr.bf16.gmra.mrb[20].mxu0 %v6474_v52  ;;  %3063 = vmatmul.mubr.bf16.gmra.mrb[20].mxu1 %v6474_v52  ;;  %v6595_v52 = vld [vmem:[#allocation3 + $0x344] ss:$16 sps:$4 sm:$0xff]   ;;  %v6597_v53 = vld [vmem:[#allocation3 + $0x340] ss:$16 sps:$4 sm:$0xff]  }
  0xc4   : > { %2366 = vmatprep.mubr.bf16.mxu0 %v6475_v54  ;;  %3072 = vmatprep.mubr.bf16.mxu1 %v6475_v54  ;;  %v6604_v54 = vld [vmem:[#allocation3 + $0x364] ss:$16 sps:$4 sm:$0xff]  }
  0xc5   : > { %2648 = vmatpush1.bf16.msra.mxu0 %v6562_v55  ;;  %3354 = vmatpush1.bf16.msra.mxu1 %v6565_v56  ;;  %v6606_v55 = vld [vmem:[#allocation3 + $0x360] ss:$16 sps:$4 sm:$0xff]   ;;  %v6607_v56 = vld [vmem:[#allocation3 + $0x384] ss:$16 sps:$4 sm:$0xff]  }
  0xc6   : > { %2649 = vmatprep.subr.bf16.mxu0 %v6576_v60  ;;  %3355 = vmatprep.subr.bf16.mxu1 %v6579_v62  ;;  %v6619_v60 = vld [vmem:[#allocation3 + $0x3c4] ss:$16 sps:$4 sm:$0xff]  }
  0xc7   : > { %v6628_v62 = vld [vmem:[#allocation3 + $0x3e4] ss:$16 sps:$4 sm:$0xff]  }
  0xc9   : > { %2650 = vmatpush1.bf16.msra.mxu0 %v6574_v59  ;;  %3356 = vmatpush1.bf16.msra.mxu1 %v6577_v61  ;;  %v6618_v59 = vld [vmem:[#allocation3 + $0x3a0] ss:$16 sps:$4 sm:$0xff]  }
  0xca   : > { %2651 = vmatprep.subr.bf16.mxu0 %v6588_v4  ;;  %3357 = vmatprep.subr.bf16.mxu1 %v6591_v6  ;;  %v6621_v61 = vld [vmem:[#allocation3 + $0x3c0] ss:$16 sps:$4 sm:$0xff]   ;;  %v6637_v4 = vld [vmem:[#allocation3 + $0x4c] ss:$16 sps:$4 sm:$0xff]  }
  0xcb   : > { %2367 = vmatmul.mubr.bf16.gmra.mrb[24].mxu0 %v6477_v57  ;;  %3073 = vmatmul.mubr.bf16.gmra.mrb[24].mxu1 %v6477_v57  ;;  %v6609_v57 = vld [vmem:[#allocation3 + $0x380] ss:$16 sps:$4 sm:$0xff]   ;;  %v6640_v6 = vld [vmem:[#allocation3 + $0x6c] ss:$16 sps:$4 sm:$0xff]  }
  0xcc   : > { %2376 = vmatprep.mubr.bf16.mxu0 %v6484_v58  ;;  %3082 = vmatprep.mubr.bf16.mxu1 %v6484_v58  ;;  %v6616_v58 = vld [vmem:[#allocation3 + $0x3a4] ss:$16 sps:$4 sm:$0xff]  }
  0xcd   : > { %2652 = vmatpush1.bf16.msra.mxu0 %v6586_v3  ;;  %3358 = vmatpush1.bf16.msra.mxu1 %v6589_v5  ;;  %v6636_v3 = vld [vmem:[#allocation3 + $0x28] ss:$16 sps:$4 sm:$0xff]  }
  0xce   : > { %2653 = vmatprep.subr.bf16.mxu0 %v6600_v12  ;;  %3359 = vmatprep.subr.bf16.mxu1 %v6603_v14  ;;  %v6639_v5 = vld [vmem:[#allocation3 + $0x48] ss:$16 sps:$4 sm:$0xff]   ;;  %v6649_v12 = vld [vmem:[#allocation3 + $0xcc] ss:$16 sps:$4 sm:$0xff]  }
  0xcf   : > { %v6652_v14 = vld [vmem:[#allocation3 + $0xec] ss:$16 sps:$4 sm:$0xff]  }
  0xd1   : > { %2654 = vmatpush1.bf16.msra.mxu0 %v6598_v11  ;;  %3360 = vmatpush1.bf16.msra.mxu1 %v6601_v13  ;;  %v6648_v11 = vld [vmem:[#allocation3 + $0xa8] ss:$16 sps:$4 sm:$0xff]  }
  0xd2   : > { %2655 = vmatprep.subr.bf16.mxu0 %v6612_v20  ;;  %3361 = vmatprep.subr.bf16.mxu1 %v6615_v22  ;;  %v6651_v13 = vld [vmem:[#allocation3 + $0xc8] ss:$16 sps:$4 sm:$0xff]   ;;  %v6661_v20 = vld [vmem:[#allocation3 + $0x14c] ss:$16 sps:$4 sm:$0xff]  }
  0xd3   : > { %2377 = vmatmul.mubr.bf16.gmra.mrb[28].mxu0 %v6486_v63  ;;  %3083 = vmatmul.mubr.bf16.gmra.mrb[28].mxu1 %v6486_v63  ;;  %v6630_v63 = vld [vmem:[#allocation3 + $0x3e0] ss:$16 sps:$4 sm:$0xff]   ;;  %v6664_v22 = vld [vmem:[#allocation3 + $0x16c] ss:$16 sps:$4 sm:$0xff]  }
  0xd4   : > { %2386 = vmatprep.mubr.bf16.mxu0 %v6487_v0  ;;  %3092 = vmatprep.mubr.bf16.mxu1 %v6487_v0  ;;  %v6633_v0 = vld [vmem:[#allocation3 + $0xc] ss:$16 sps:$4 sm:$0xff]  }
  0xd5   : > { %2656 = vmatpush1.bf16.msra.mxu0 %v6610_v19  ;;  %3362 = vmatpush1.bf16.msra.mxu1 %v6613_v21  ;;  %v6660_v19 = vld [vmem:[#allocation3 + $0x128] ss:$16 sps:$4 sm:$0xff]  }
  0xd6   : > { %2657 = vmatprep.subr.bf16.mxu0 %v6624_v28  ;;  %3363 = vmatprep.subr.bf16.mxu1 %v6627_v30  ;;  %v6663_v21 = vld [vmem:[#allocation3 + $0x148] ss:$16 sps:$4 sm:$0xff]   ;;  %v6673_v28 = vld [vmem:[#allocation3 + $0x1cc] ss:$16 sps:$4 sm:$0xff]  }
  0xd7   : > { %v6676_v30 = vld [vmem:[#allocation3 + $0x1ec] ss:$16 sps:$4 sm:$0xff]  }
  0xd9   : > { %2658 = vmatpush1.bf16.msra.mxu0 %v6622_v27  ;;  %3364 = vmatpush1.bf16.msra.mxu1 %v6625_v29  ;;  %v6672_v27 = vld [vmem:[#allocation3 + $0x1a8] ss:$16 sps:$4 sm:$0xff]  }
  0xda   : > { %v6675_v29 = vld [vmem:[#allocation3 + $0x1c8] ss:$16 sps:$4 sm:$0xff]  }
  0xdb   : > { %2387 = vmatmul.mubr.bf16.gmra.mrb[32].mxu0 %v6489_v1  ;;  %3093 = vmatmul.mubr.bf16.gmra.mrb[32].mxu1 %v6489_v1  ;;  %v6631_v1 = vld [vmem:[#allocation3 + $0x8] ss:$16 sps:$4 sm:$0xff]  }
  0xdc   : > { %2396 = vmatprep.mubr.bf16.mxu0 %v6496_v2  ;;  %3102 = vmatprep.mubr.bf16.mxu1 %v6496_v2  ;;  %v6634_v2 = vld [vmem:[#allocation3 + $0x2c] ss:$16 sps:$4 sm:$0xff]  }
  0xe3   : > { %2397 = vmatmul.mubr.bf16.gmra.mrb[36].mxu0 %v6498_v7  ;;  %3103 = vmatmul.mubr.bf16.gmra.mrb[36].mxu1 %v6498_v7  ;;  %v6642_v7 = vld [vmem:[#allocation3 + $0x68] ss:$16 sps:$4 sm:$0xff]  }
  0xe4   : > { %2406 = vmatprep.mubr.bf16.mxu0 %v6499_v8  ;;  %3112 = vmatprep.mubr.bf16.mxu1 %v6499_v8  ;;  %v6643_v8 = vld [vmem:[#allocation3 + $0x8c] ss:$16 sps:$4 sm:$0xff]  }
  0xeb   : > { %2407 = vmatmul.mubr.bf16.gmra.mrb[40].mxu0 %v6501_v9  ;;  %3113 = vmatmul.mubr.bf16.gmra.mrb[40].mxu1 %v6501_v9  ;;  %v6645_v9 = vld [vmem:[#allocation3 + $0x88] ss:$16 sps:$4 sm:$0xff]  }
  0xec   : > { %2416 = vmatprep.mubr.bf16.mxu0 %v6508_v10  ;;  %3122 = vmatprep.mubr.bf16.mxu1 %v6508_v10  ;;  %v6646_v10 = vld [vmem:[#allocation3 + $0xac] ss:$16 sps:$4 sm:$0xff]  }
  0xf3   : > { %2417 = vmatmul.mubr.bf16.gmra.mrb[44].mxu0 %v6510_v15  ;;  %3123 = vmatmul.mubr.bf16.gmra.mrb[44].mxu1 %v6510_v15  ;;  %v6654_v15 = vld [vmem:[#allocation3 + $0xe8] ss:$16 sps:$4 sm:$0xff]  }
  0xf4   : > { %2426 = vmatprep.mubr.bf16.mxu0 %v6511_v16  ;;  %3132 = vmatprep.mubr.bf16.mxu1 %v6511_v16  ;;  %v6655_v16 = vld [vmem:[#allocation3 + $0x10c] ss:$16 sps:$4 sm:$0xff]  }
  0xfb   : > { %2427 = vmatmul.mubr.bf16.gmra.mrb[48].mxu0 %v6513_v17  ;;  %3133 = vmatmul.mubr.bf16.gmra.mrb[48].mxu1 %v6513_v17  ;;  %v6657_v17 = vld [vmem:[#allocation3 + $0x108] ss:$16 sps:$4 sm:$0xff]  }
  0xfc   : > { %2436 = vmatprep.mubr.bf16.mxu0 %v6520_v18  ;;  %3142 = vmatprep.mubr.bf16.mxu1 %v6520_v18  ;;  %v6658_v18 = vld [vmem:[#allocation3 + $0x12c] ss:$16 sps:$4 sm:$0xff]  }
 0x103   : > { %2437 = vmatmul.mubr.bf16.gmra.mrb[52].mxu0 %v6522_v23  ;;  %3143 = vmatmul.mubr.bf16.gmra.mrb[52].mxu1 %v6522_v23  ;;  %v6666_v23 = vld [vmem:[#allocation3 + $0x168] ss:$16 sps:$4 sm:$0xff]  }
 0x104   : > { %2446 = vmatprep.mubr.bf16.mxu0 %v6523_v24  ;;  %3152 = vmatprep.mubr.bf16.mxu1 %v6523_v24  ;;  %v6667_v24 = vld [vmem:[#allocation3 + $0x18c] ss:$16 sps:$4 sm:$0xff]  }
 0x10b   : > { %2447 = vmatmul.mubr.bf16.gmra.mrb[56].mxu0 %v6525_v25  ;;  %3153 = vmatmul.mubr.bf16.gmra.mrb[56].mxu1 %v6525_v25  ;;  %v6669_v25 = vld [vmem:[#allocation3 + $0x188] ss:$16 sps:$4 sm:$0xff]  }
 0x10c   : > { %2456 = vmatprep.mubr.bf16.mxu0 %v6532_v26  ;;  %3162 = vmatprep.mubr.bf16.mxu1 %v6532_v26  ;;  %v6670_v26 = vld [vmem:[#allocation3 + $0x1ac] ss:$16 sps:$4 sm:$0xff]  }
 0x113   : > { %2457 = vmatmul.mubr.bf16.gmra.mrb[60].mxu0 %v6534_v31  ;;  %3163 = vmatmul.mubr.bf16.gmra.mrb[60].mxu1 %v6534_v31  ;;  %v6678_v31 = vld [vmem:[#allocation3 + $0x1e8] ss:$16 sps:$4 sm:$0xff]  }
 0x114   : > { %2466 = vmatprep.mubr.bf16.mxu0 %v6535_v32  ;;  %3172 = vmatprep.mubr.bf16.mxu1 %v6535_v32  ;;  %v6679_v32 = vld [vmem:[#allocation3 + $0x20c] ss:$16 sps:$4 sm:$0xff]  }
 0x11b   : > { %2467 = vmatmul.mubr.bf16.gmra.mrb[64].mxu0 %v6537_v33  ;;  %3173 = vmatmul.mubr.bf16.gmra.mrb[64].mxu1 %v6537_v33  ;;  %v6681_v33 = vld [vmem:[#allocation3 + $0x208] ss:$16 sps:$4 sm:$0xff]  }
 0x11c   : > { %2476 = vmatprep.mubr.bf16.mxu0 %v6544_v34  ;;  %3182 = vmatprep.mubr.bf16.mxu1 %v6544_v34  ;;  %v6682_v34 = vld [vmem:[#allocation3 + $0x22c] ss:$16 sps:$4 sm:$0xff]  }
 0x123   : > { %2477 = vmatmul.mubr.bf16.gmra.mrb[68].mxu0 %v6546_v35  ;;  %3183 = vmatmul.mubr.bf16.gmra.mrb[68].mxu1 %v6546_v35  ;;  %v6684_v35 = vld [vmem:[#allocation3 + $0x228] ss:$16 sps:$4 sm:$0xff]  }
 0x124   : > { %2486 = vmatprep.mubr.bf16.mxu0 %v6547_v36  ;;  %3192 = vmatprep.mubr.bf16.mxu1 %v6547_v36  ;;  %v6685_v36 = vld [vmem:[#allocation3 + $0x24c] ss:$16 sps:$4 sm:$0xff]  }
 0x12b   : > { %2487 = vmatmul.mubr.bf16.gmra.mrb[72].mxu0 %v6549_v37  ;;  %3193 = vmatmul.mubr.bf16.gmra.mrb[72].mxu1 %v6549_v37  ;;  %v6687_v37 = vld [vmem:[#allocation3 + $0x248] ss:$16 sps:$4 sm:$0xff]  }
 0x12c   : > { %2496 = vmatprep.mubr.bf16.mxu0 %v6556_v38  ;;  %3202 = vmatprep.mubr.bf16.mxu1 %v6556_v38  ;;  %v6688_v38 = vld [vmem:[#allocation3 + $0x26c] ss:$16 sps:$4 sm:$0xff]  }
 0x133   : > { %2497 = vmatmul.mubr.bf16.gmra.mrb[76].mxu0 %v6558_v39  ;;  %3203 = vmatmul.mubr.bf16.gmra.mrb[76].mxu1 %v6558_v39  ;;  %v6690_v39 = vld [vmem:[#allocation3 + $0x268] ss:$16 sps:$4 sm:$0xff]  }
 0x134   : > { %2506 = vmatprep.mubr.bf16.mxu0 %v6559_v40  ;;  %3212 = vmatprep.mubr.bf16.mxu1 %v6559_v40  ;;  %v6691_v40 = vld [vmem:[#allocation3 + $0x28c] ss:$16 sps:$4 sm:$0xff]  }
 0x13b   : > { %2507 = vmatmul.mubr.bf16.gmra.mrb[80].mxu0 %v6561_v41  ;;  %3213 = vmatmul.mubr.bf16.gmra.mrb[80].mxu1 %v6561_v41  ;;  %v6693_v41 = vld [vmem:[#allocation3 + $0x288] ss:$16 sps:$4 sm:$0xff]  }
 0x13c   : > { %2516 = vmatprep.mubr.bf16.mxu0 %v6568_v42  ;;  %3222 = vmatprep.mubr.bf16.mxu1 %v6568_v42  ;;  %v6694_v42 = vld [vmem:[#allocation3 + $0x2ac] ss:$16 sps:$4 sm:$0xff]  }
 0x143   : > { %2517 = vmatmul.mubr.bf16.gmra.mrb[84].mxu0 %v6570_v43  ;;  %3223 = vmatmul.mubr.bf16.gmra.mrb[84].mxu1 %v6570_v43  ;;  %v6696_v43 = vld [vmem:[#allocation3 + $0x2a8] ss:$16 sps:$4 sm:$0xff]  }
 0x144   : > { %2526 = vmatprep.mubr.bf16.mxu0 %v6571_v44  ;;  %3232 = vmatprep.mubr.bf16.mxu1 %v6571_v44  ;;  %v6697_v44 = vld [vmem:[#allocation3 + $0x2cc] ss:$16 sps:$4 sm:$0xff]  }
 0x14b   : > { %2527 = vmatmul.mubr.bf16.gmra.mrb[88].mxu0 %v6573_v45  ;;  %3233 = vmatmul.mubr.bf16.gmra.mrb[88].mxu1 %v6573_v45  ;;  %v6699_v45 = vld [vmem:[#allocation3 + $0x2c8] ss:$16 sps:$4 sm:$0xff]  }
 0x14c   : > { %2536 = vmatprep.mubr.bf16.mxu0 %v6580_v46  ;;  %3242 = vmatprep.mubr.bf16.mxu1 %v6580_v46  ;;  %v6700_v46 = vld [vmem:[#allocation3 + $0x2ec] ss:$16 sps:$4 sm:$0xff]  }
 0x153   : > { %2537 = vmatmul.mubr.bf16.gmra.mrb[92].mxu0 %v6582_v47  ;;  %3243 = vmatmul.mubr.bf16.gmra.mrb[92].mxu1 %v6582_v47  ;;  %v6702_v47 = vld [vmem:[#allocation3 + $0x2e8] ss:$16 sps:$4 sm:$0xff]  }
 0x154   : > { %2546 = vmatprep.mubr.bf16.mxu0 %v6583_v48  ;;  %3252 = vmatprep.mubr.bf16.mxu1 %v6583_v48  ;;  %v6703_v48 = vld [vmem:[#allocation3 + $0x30c] ss:$16 sps:$4 sm:$0xff]  }
 0x15b   : > { %2547 = vmatmul.mubr.bf16.gmra.mrb[96].mxu0 %v6585_v49  ;;  %3253 = vmatmul.mubr.bf16.gmra.mrb[96].mxu1 %v6585_v49  ;;  %v6705_v49 = vld [vmem:[#allocation3 + $0x308] ss:$16 sps:$4 sm:$0xff]  }
 0x15c   : > { %2556 = vmatprep.mubr.bf16.mxu0 %v6592_v50  ;;  %3262 = vmatprep.mubr.bf16.mxu1 %v6592_v50  ;;  %v6706_v50 = vld [vmem:[#allocation3 + $0x32c] ss:$16 sps:$4 sm:$0xff]  }
 0x163   : > { %2557 = vmatmul.mubr.bf16.gmra.mrb[100].mxu0 %v6594_v51  ;;  %3263 = vmatmul.mubr.bf16.gmra.mrb[100].mxu1 %v6594_v51  ;;  %v6708_v51 = vld [vmem:[#allocation3 + $0x328] ss:$16 sps:$4 sm:$0xff]  }
 0x164   : > { %2566 = vmatprep.mubr.bf16.mxu0 %v6595_v52  ;;  %3272 = vmatprep.mubr.bf16.mxu1 %v6595_v52  ;;  %v6709_v52 = vld [vmem:[#allocation3 + $0x34c] ss:$16 sps:$4 sm:$0xff]  }
 0x16b   : > { %2567 = vmatmul.mubr.bf16.gmra.mrb[104].mxu0 %v6597_v53  ;;  %3273 = vmatmul.mubr.bf16.gmra.mrb[104].mxu1 %v6597_v53  ;;  %v6711_v53 = vld [vmem:[#allocation3 + $0x348] ss:$16 sps:$4 sm:$0xff]  }
 0x16c   : > { %2576 = vmatprep.mubr.bf16.mxu0 %v6604_v54  ;;  %3282 = vmatprep.mubr.bf16.mxu1 %v6604_v54  ;;  %v6712_v54 = vld [vmem:[#allocation3 + $0x36c] ss:$16 sps:$4 sm:$0xff]  }
 0x173   : > { %2577 = vmatmul.mubr.bf16.gmra.mrb[108].mxu0 %v6606_v55  ;;  %3283 = vmatmul.mubr.bf16.gmra.mrb[108].mxu1 %v6606_v55 }
 0x174   : > { %2586 = vmatprep.mubr.bf16.mxu0 %v6607_v56  ;;  %3292 = vmatprep.mubr.bf16.mxu1 %v6607_v56 }
 0x17b   : > { %2587 = vmatmul.mubr.bf16.gmra.mrb[112].mxu0 %v6609_v57  ;;  %3293 = vmatmul.mubr.bf16.gmra.mrb[112].mxu1 %v6609_v57 }
 0x17c   : > { %2596 = vmatprep.mubr.bf16.mxu0 %v6616_v58  ;;  %3302 = vmatprep.mubr.bf16.mxu1 %v6616_v58 }
 0x183   : > { %2597 = vmatmul.mubr.bf16.gmra.mrb[116].mxu0 %v6618_v59  ;;  %3303 = vmatmul.mubr.bf16.gmra.mrb[116].mxu1 %v6618_v59  ;;  %v6714_v59 = vld [vmem:[#allocation3 + $0x368] ss:$16 sps:$4 sm:$0xff]  }
 0x184   : > { %2606 = vmatprep.mubr.bf16.mxu0 %v6619_v60  ;;  %3312 = vmatprep.mubr.bf16.mxu1 %v6619_v60 }
 0x18b   : > { %2607 = vmatmul.mubr.bf16.gmra.mrb[120].mxu0 %v6621_v61  ;;  %3313 = vmatmul.mubr.bf16.gmra.mrb[120].mxu1 %v6621_v61 }
 0x18c   : > { %2616 = vmatprep.mubr.bf16.mxu0 %v6628_v62  ;;  %3322 = vmatprep.mubr.bf16.mxu1 %v6628_v62 }
 0x193   : > { %2617 = vmatmul.mubr.bf16.gmra.mrb[124].mxu0 %v6630_v63  ;;  %3323 = vmatmul.mubr.bf16.gmra.mrb[124].mxu1 %v6630_v63 }
 0x194   : > { %2659 = vmatprep.mubr.bf16.mxu0 %v6633_v0  ;;  %3365 = vmatprep.mubr.bf16.mxu1 %v6633_v0  ;;  %v6715_v0 = vld [vmem:[#allocation3 + $0x38c] ss:$16 sps:$4 sm:$0xff]  }
 0x19b   : > { %2660 = vmatmul.mubr.bf16.vlgmr.msra.gmra.mrb[0].mxu0 %v6631_v1  ;;  %3366 = vmatmul.mubr.bf16.vlgmr.msra.gmra.mrb[0].mxu1 %v6631_v1 }
 0x19c   : > { %2669 = vmatprep.mubr.bf16.mxu0 %v6634_v2  ;;  %3375 = vmatprep.mubr.bf16.mxu1 %v6634_v2 }
 0x1a3   : > { %2670 = vmatmul.mubr.bf16.gmra.mrb[4].mxu0 %v6636_v3  ;;  %3376 = vmatmul.mubr.bf16.gmra.mrb[4].mxu1 %v6636_v3 }
 0x1a4   : > { %2679 = vmatprep.mubr.bf16.mxu0 %v6637_v4  ;;  %3385 = vmatprep.mubr.bf16.mxu1 %v6637_v4 }
 0x1ab   : > { %2680 = vmatmul.mubr.bf16.gmra.mrb[8].mxu0 %v6639_v5  ;;  %3386 = vmatmul.mubr.bf16.gmra.mrb[8].mxu1 %v6639_v5 }
 0x1ac   : > { %2689 = vmatprep.mubr.bf16.mxu0 %v6640_v6  ;;  %3395 = vmatprep.mubr.bf16.mxu1 %v6640_v6 }
 0x1b3   : > { %2690 = vmatmul.mubr.bf16.gmra.mrb[12].mxu0 %v6642_v7  ;;  %3396 = vmatmul.mubr.bf16.gmra.mrb[12].mxu1 %v6642_v7 }
 0x1b4   : > { %2699 = vmatprep.mubr.bf16.mxu0 %v6643_v8  ;;  %3405 = vmatprep.mubr.bf16.mxu1 %v6643_v8 }
 0x1bb   : > { %2700 = vmatmul.mubr.bf16.gmra.mrb[16].mxu0 %v6645_v9  ;;  %3406 = vmatmul.mubr.bf16.gmra.mrb[16].mxu1 %v6645_v9  ;;  %v6717_v9 = vld [vmem:[#allocation3 + $0x388] ss:$16 sps:$4 sm:$0xff]  }
 0x1bc   : > { %2709 = vmatprep.mubr.bf16.mxu0 %v6646_v10  ;;  %3415 = vmatprep.mubr.bf16.mxu1 %v6646_v10 }
 0x1c3   : > { %2710 = vmatmul.mubr.bf16.gmra.mrb[20].mxu0 %v6648_v11  ;;  %3416 = vmatmul.mubr.bf16.gmra.mrb[20].mxu1 %v6648_v11 }
 0x1c4   : > { %2719 = vmatprep.mubr.bf16.mxu0 %v6649_v12  ;;  %3425 = vmatprep.mubr.bf16.mxu1 %v6649_v12 }
 0x1cb   : > { %2720 = vmatmul.mubr.bf16.gmra.mrb[24].mxu0 %v6651_v13  ;;  %3426 = vmatmul.mubr.bf16.gmra.mrb[24].mxu1 %v6651_v13 }
 0x1cc   : > { %2729 = vmatprep.mubr.bf16.mxu0 %v6652_v14  ;;  %3435 = vmatprep.mubr.bf16.mxu1 %v6652_v14  ;;  %v6718_v14 = vld [vmem:[#allocation3 + $0x3ac] ss:$16 sps:$4 sm:$0xff]  }
 0x1d3   : > { %2730 = vmatmul.mubr.bf16.gmra.mrb[28].mxu0 %v6654_v15  ;;  %3436 = vmatmul.mubr.bf16.gmra.mrb[28].mxu1 %v6654_v15 }
 0x1d4   : > { %2739 = vmatprep.mubr.bf16.mxu0 %v6655_v16  ;;  %3445 = vmatprep.mubr.bf16.mxu1 %v6655_v16 }
 0x1db   : > { %2740 = vmatmul.mubr.bf16.gmra.mrb[32].mxu0 %v6657_v17  ;;  %3446 = vmatmul.mubr.bf16.gmra.mrb[32].mxu1 %v6657_v17 }
 0x1dc   : > { %2749 = vmatprep.mubr.bf16.mxu0 %v6658_v18  ;;  %3455 = vmatprep.mubr.bf16.mxu1 %v6658_v18 }
 0x1e3   : > { %2750 = vmatmul.mubr.bf16.gmra.mrb[36].mxu0 %v6660_v19  ;;  %3456 = vmatmul.mubr.bf16.gmra.mrb[36].mxu1 %v6660_v19 }
 0x1e4   : > { %2759 = vmatprep.mubr.bf16.mxu0 %v6661_v20  ;;  %3465 = vmatprep.mubr.bf16.mxu1 %v6661_v20 }
 0x1eb   : > { %2760 = vmatmul.mubr.bf16.gmra.mrb[40].mxu0 %v6663_v21  ;;  %3466 = vmatmul.mubr.bf16.gmra.mrb[40].mxu1 %v6663_v21 }
 0x1ec   : > { %2769 = vmatprep.mubr.bf16.mxu0 %v6664_v22  ;;  %3475 = vmatprep.mubr.bf16.mxu1 %v6664_v22 }
 0x1f3   : > { %2770 = vmatmul.mubr.bf16.gmra.mrb[44].mxu0 %v6666_v23  ;;  %3476 = vmatmul.mubr.bf16.gmra.mrb[44].mxu1 %v6666_v23  ;;  %v6720_v23 = vld [vmem:[#allocation3 + $0x3a8] ss:$16 sps:$4 sm:$0xff]  }
 0x1f4   : > { %2779 = vmatprep.mubr.bf16.mxu0 %v6667_v24  ;;  %3485 = vmatprep.mubr.bf16.mxu1 %v6667_v24 }
 0x1fb   : > { %2780 = vmatmul.mubr.bf16.gmra.mrb[48].mxu0 %v6669_v25  ;;  %3486 = vmatmul.mubr.bf16.gmra.mrb[48].mxu1 %v6669_v25 }
 0x1fc   : > { %2789 = vmatprep.mubr.bf16.mxu0 %v6670_v26  ;;  %3495 = vmatprep.mubr.bf16.mxu1 %v6670_v26 }
 0x203   : > { %2790 = vmatmul.mubr.bf16.gmra.mrb[52].mxu0 %v6672_v27  ;;  %3496 = vmatmul.mubr.bf16.gmra.mrb[52].mxu1 %v6672_v27 }
 0x204   : > { %2799 = vmatprep.mubr.bf16.mxu0 %v6673_v28  ;;  %3505 = vmatprep.mubr.bf16.mxu1 %v6673_v28  ;;  %v6721_v28 = vld [vmem:[#allocation3 + $0x3cc] ss:$16 sps:$4 sm:$0xff]  }
 0x20b   : > { %2800 = vmatmul.mubr.bf16.gmra.mrb[56].mxu0 %v6675_v29  ;;  %3506 = vmatmul.mubr.bf16.gmra.mrb[56].mxu1 %v6675_v29 }
 0x20c   : > { %2809 = vmatprep.mubr.bf16.mxu0 %v6676_v30  ;;  %3515 = vmatprep.mubr.bf16.mxu1 %v6676_v30 }
 0x213   : > { %2810 = vmatmul.mubr.bf16.gmra.mrb[60].mxu0 %v6678_v31  ;;  %3516 = vmatmul.mubr.bf16.gmra.mrb[60].mxu1 %v6678_v31 }
 0x214   : > { %2819 = vmatprep.mubr.bf16.mxu0 %v6679_v32  ;;  %3525 = vmatprep.mubr.bf16.mxu1 %v6679_v32 }
 0x21b   : > { %2820 = vmatmul.mubr.bf16.gmra.mrb[64].mxu0 %v6681_v33  ;;  %3526 = vmatmul.mubr.bf16.gmra.mrb[64].mxu1 %v6681_v33 }
 0x21c   : > { %2829 = vmatprep.mubr.bf16.mxu0 %v6682_v34  ;;  %3535 = vmatprep.mubr.bf16.mxu1 %v6682_v34 }
 0x223   : > { %2830 = vmatmul.mubr.bf16.gmra.mrb[68].mxu0 %v6684_v35  ;;  %3536 = vmatmul.mubr.bf16.gmra.mrb[68].mxu1 %v6684_v35 }
 0x224   : > { %2839 = vmatprep.mubr.bf16.mxu0 %v6685_v36  ;;  %3545 = vmatprep.mubr.bf16.mxu1 %v6685_v36 }
 0x22b   : > { %2840 = vmatmul.mubr.bf16.gmra.mrb[72].mxu0 %v6687_v37  ;;  %3546 = vmatmul.mubr.bf16.gmra.mrb[72].mxu1 %v6687_v37  ;;  %v6723_v37 = vld [vmem:[#allocation3 + $0x3c8] ss:$16 sps:$4 sm:$0xff]  }
 0x22c   : > { %2849 = vmatprep.mubr.bf16.mxu0 %v6688_v38  ;;  %3555 = vmatprep.mubr.bf16.mxu1 %v6688_v38 }
 0x233   : > { %2850 = vmatmul.mubr.bf16.gmra.mrb[76].mxu0 %v6690_v39  ;;  %3556 = vmatmul.mubr.bf16.gmra.mrb[76].mxu1 %v6690_v39 }
 0x234   : > { %2859 = vmatprep.mubr.bf16.mxu0 %v6691_v40  ;;  %3565 = vmatprep.mubr.bf16.mxu1 %v6691_v40 }
 0x23b   : > { %2860 = vmatmul.mubr.bf16.gmra.mrb[80].mxu0 %v6693_v41  ;;  %3566 = vmatmul.mubr.bf16.gmra.mrb[80].mxu1 %v6693_v41 }
 0x23c   : > { %2869 = vmatprep.mubr.bf16.mxu0 %v6694_v42  ;;  %3575 = vmatprep.mubr.bf16.mxu1 %v6694_v42  ;;  %v6724_v42 = vld [vmem:[#allocation3 + $0x3ec] ss:$16 sps:$4 sm:$0xff]  }
 0x243   : > { %2870 = vmatmul.mubr.bf16.gmra.mrb[84].mxu0 %v6696_v43  ;;  %3576 = vmatmul.mubr.bf16.gmra.mrb[84].mxu1 %v6696_v43 }
 0x244   : > { %2879 = vmatprep.mubr.bf16.mxu0 %v6697_v44  ;;  %3585 = vmatprep.mubr.bf16.mxu1 %v6697_v44 }
 0x24b   : > { %2880 = vmatmul.mubr.bf16.gmra.mrb[88].mxu0 %v6699_v45  ;;  %3586 = vmatmul.mubr.bf16.gmra.mrb[88].mxu1 %v6699_v45 }
 0x24c   : > { %2889 = vmatprep.mubr.bf16.mxu0 %v6700_v46  ;;  %3595 = vmatprep.mubr.bf16.mxu1 %v6700_v46 }
 0x253   : > { %2890 = vmatmul.mubr.bf16.gmra.mrb[92].mxu0 %v6702_v47  ;;  %3596 = vmatmul.mubr.bf16.gmra.mrb[92].mxu1 %v6702_v47 }
 0x254   : > { %2899 = vmatprep.mubr.bf16.mxu0 %v6703_v48  ;;  %3605 = vmatprep.mubr.bf16.mxu1 %v6703_v48 }
 0x25b   : > { %2900 = vmatmul.mubr.bf16.gmra.mrb[96].mxu0 %v6705_v49  ;;  %3606 = vmatmul.mubr.bf16.gmra.mrb[96].mxu1 %v6705_v49 }
 0x25c   : > { %2909 = vmatprep.mubr.bf16.mxu0 %v6706_v50  ;;  %3615 = vmatprep.mubr.bf16.mxu1 %v6706_v50 }
 0x263   : > { %2910 = vmatmul.mubr.bf16.gmra.mrb[100].mxu0 %v6708_v51  ;;  %3616 = vmatmul.mubr.bf16.gmra.mrb[100].mxu1 %v6708_v51  ;;  %v6726_v51 = vld [vmem:[#allocation3 + $0x3e8] ss:$16 sps:$4 sm:$0xff]  }
 0x264   : > { %2919 = vmatprep.mubr.bf16.mxu0 %v6709_v52  ;;  %3625 = vmatprep.mubr.bf16.mxu1 %v6709_v52 }
 0x26b   : > { %2920 = vmatmul.mubr.bf16.gmra.mrb[104].mxu0 %v6711_v53  ;;  %3626 = vmatmul.mubr.bf16.gmra.mrb[104].mxu1 %v6711_v53 }
 0x26c   : > { %2929 = vmatprep.mubr.bf16.mxu0 %v6712_v54  ;;  %3635 = vmatprep.mubr.bf16.mxu1 %v6712_v54 }
 0x26e   : > { %v2661_v55 = vpop.f32.mrb[0].mxu0  ;;  %v3367_v56 = vpop.f32.mrb[0].mxu1 }
 0x26f   : > { %v2663_v57 = vpop.f32.mrb[1].mxu0  ;;  %v3369_v58 = vpop.f32.mrb[1].mxu1 }
 0x270   : > { %v5879_v60 = vpack.c.bf16 %v2663_v57, %v2661_v55  ;;  %v5880_v61 = vpack.c.bf16 %v3369_v58, %v3367_v56  ;;  %v2665_v62 = vpop.f32.mrb[2].mxu0  ;;  %v3371_v63 = vpop.f32.mrb[2].mxu1 }
 0x271   : > { %v2667_v1 = vpop.f32.mrb[3].mxu0  ;;  %v3373_v2 = vpop.f32.mrb[3].mxu1 }
 0x272   : > { %5225 = vst [vmem:[%s7201_s17] sm:$0xff] %v5879_v60  ;;  %5226 = vst [vmem:[%s7201_s17 + $0x8] sm:$0xff] %v5880_v61  ;;  %v5881_v3 = vpack.c.bf16 %v2667_v1, %v2665_v62  ;;  %v5882_v4 = vpack.c.bf16 %v3373_v2, %v3371_v63 }
 0x273   : > { %2930 = vmatmul.mubr.bf16.gmra.mrb[108].mxu0 %v6714_v59  ;;  %3636 = vmatmul.mubr.bf16.gmra.mrb[108].mxu1 %v6714_v59 }
 0x274   : > { %5227 = vst [vmem:[%s7201_s17 + $0x10] sm:$0xff] %v5881_v3  ;;  %5228 = vst [vmem:[%s7201_s17 + $0x18] sm:$0xff] %v5882_v4  ;;  %2939 = vmatprep.mubr.bf16.mxu0 %v6715_v0  ;;  %3645 = vmatprep.mubr.bf16.mxu1 %v6715_v0 }
 0x276   : > { %v2671_v5 = vpop.f32.mrb[4].mxu0  ;;  %v3377_v6 = vpop.f32.mrb[4].mxu1 }
 0x277   : > { %v2673_v7 = vpop.f32.mrb[5].mxu0  ;;  %v3379_v8 = vpop.f32.mrb[5].mxu1 }
 0x278   : > { %v5883_v10 = vpack.c.bf16 %v2673_v7, %v2671_v5  ;;  %v5884_v11 = vpack.c.bf16 %v3379_v8, %v3377_v6  ;;  %v2675_v12 = vpop.f32.mrb[6].mxu0  ;;  %v3381_v13 = vpop.f32.mrb[6].mxu1 }
 0x279   : > { %v2677_v15 = vpop.f32.mrb[7].mxu0  ;;  %v3383_v16 = vpop.f32.mrb[7].mxu1 }
 0x27a   : > { %5229 = vst [vmem:[%s7201_s17 + $0x20] sm:$0xff] %v5883_v10  ;;  %5230 = vst [vmem:[%s7201_s17 + $0x28] sm:$0xff] %v5884_v11  ;;  %v5885_v17 = vpack.c.bf16 %v2677_v15, %v2675_v12  ;;  %v5886_v18 = vpack.c.bf16 %v3383_v16, %v3381_v13 }
 0x27b   : > { %2940 = vmatmul.mubr.bf16.gmra.mrb[112].mxu0 %v6717_v9  ;;  %3646 = vmatmul.mubr.bf16.gmra.mrb[112].mxu1 %v6717_v9 }
 0x27c   : > { %5231 = vst [vmem:[%s7201_s17 + $0x30] sm:$0xff] %v5885_v17  ;;  %5232 = vst [vmem:[%s7201_s17 + $0x38] sm:$0xff] %v5886_v18  ;;  %2949 = vmatprep.mubr.bf16.mxu0 %v6718_v14  ;;  %3655 = vmatprep.mubr.bf16.mxu1 %v6718_v14 }
 0x27e   : > { %v2681_v19 = vpop.f32.mrb[8].mxu0  ;;  %v3387_v20 = vpop.f32.mrb[8].mxu1 }
 0x27f   : > { %v2683_v21 = vpop.f32.mrb[9].mxu0  ;;  %v3389_v22 = vpop.f32.mrb[9].mxu1 }
 0x280   : > { %v5887_v24 = vpack.c.bf16 %v2683_v21, %v2681_v19  ;;  %v5888_v25 = vpack.c.bf16 %v3389_v22, %v3387_v20  ;;  %v2685_v26 = vpop.f32.mrb[10].mxu0  ;;  %v3391_v27 = vpop.f32.mrb[10].mxu1 }
 0x281   : > { %v2687_v29 = vpop.f32.mrb[11].mxu0  ;;  %v3393_v30 = vpop.f32.mrb[11].mxu1 }
 0x282   : > { %5233 = vst [vmem:[%s7201_s17 + $0x40] sm:$0xff] %v5887_v24  ;;  %5234 = vst [vmem:[%s7201_s17 + $0x48] sm:$0xff] %v5888_v25  ;;  %v5889_v31 = vpack.c.bf16 %v2687_v29, %v2685_v26  ;;  %v5890_v32 = vpack.c.bf16 %v3393_v30, %v3391_v27 }
 0x283   : > { %2950 = vmatmul.mubr.bf16.gmra.mrb[116].mxu0 %v6720_v23  ;;  %3656 = vmatmul.mubr.bf16.gmra.mrb[116].mxu1 %v6720_v23 }
 0x284   : > { %5235 = vst [vmem:[%s7201_s17 + $0x50] sm:$0xff] %v5889_v31  ;;  %5236 = vst [vmem:[%s7201_s17 + $0x58] sm:$0xff] %v5890_v32  ;;  %2959 = vmatprep.mubr.bf16.mxu0 %v6721_v28  ;;  %3665 = vmatprep.mubr.bf16.mxu1 %v6721_v28 }
 0x286   : > { %v2691_v33 = vpop.f32.mrb[12].mxu0  ;;  %v3397_v34 = vpop.f32.mrb[12].mxu1 }
 0x287   : > { %v2693_v35 = vpop.f32.mrb[13].mxu0  ;;  %v3399_v36 = vpop.f32.mrb[13].mxu1 }
 0x288   : > { %v5891_v38 = vpack.c.bf16 %v2693_v35, %v2691_v33  ;;  %v5892_v39 = vpack.c.bf16 %v3399_v36, %v3397_v34  ;;  %v2695_v40 = vpop.f32.mrb[14].mxu0  ;;  %v3401_v41 = vpop.f32.mrb[14].mxu1 }
 0x289   : > { %v2697_v43 = vpop.f32.mrb[15].mxu0  ;;  %v3403_v44 = vpop.f32.mrb[15].mxu1 }
 0x28a   : > { %5237 = vst [vmem:[%s7201_s17 + $0x60] sm:$0xff] %v5891_v38  ;;  %5238 = vst [vmem:[%s7201_s17 + $0x68] sm:$0xff] %v5892_v39  ;;  %v5893_v45 = vpack.c.bf16 %v2697_v43, %v2695_v40  ;;  %v5894_v46 = vpack.c.bf16 %v3403_v44, %v3401_v41 }
 0x28b   : > { %2960 = vmatmul.mubr.bf16.gmra.mrb[120].mxu0 %v6723_v37  ;;  %3666 = vmatmul.mubr.bf16.gmra.mrb[120].mxu1 %v6723_v37 }
 0x28c   : > { %5239 = vst [vmem:[%s7201_s17 + $0x70] sm:$0xff] %v5893_v45  ;;  %5240 = vst [vmem:[%s7201_s17 + $0x78] sm:$0xff] %v5894_v46  ;;  %2969 = vmatprep.mubr.bf16.mxu0 %v6724_v42  ;;  %3675 = vmatprep.mubr.bf16.mxu1 %v6724_v42 }
 0x28e   : > { %v2701_v47 = vpop.f32.mrb[16].mxu0  ;;  %v3407_v48 = vpop.f32.mrb[16].mxu1 }
 0x28f   : > { %v2703_v49 = vpop.f32.mrb[17].mxu0  ;;  %v3409_v50 = vpop.f32.mrb[17].mxu1 }
 0x290   : > { %v5895_v52 = vpack.c.bf16 %v2703_v49, %v2701_v47  ;;  %v5896_v53 = vpack.c.bf16 %v3409_v50, %v3407_v48  ;;  %v2705_v54 = vpop.f32.mrb[18].mxu0  ;;  %v3411_v55 = vpop.f32.mrb[18].mxu1 }
 0x291   : > { %v2707_v56 = vpop.f32.mrb[19].mxu0  ;;  %v3413_v57 = vpop.f32.mrb[19].mxu1 }
 0x292   : > { %5241 = vst [vmem:[%s7201_s17 + $0x80] sm:$0xff] %v5895_v52  ;;  %5242 = vst [vmem:[%s7201_s17 + $0x88] sm:$0xff] %v5896_v53  ;;  %v5897_v58 = vpack.c.bf16 %v2707_v56, %v2705_v54  ;;  %v5898_v59 = vpack.c.bf16 %v3413_v57, %v3411_v55 }
 0x293   : > { %2970 = vmatmul.mubr.bf16.gmra.mrb[124].mxu0 %v6726_v51  ;;  %3676 = vmatmul.mubr.bf16.gmra.mrb[124].mxu1 %v6726_v51 }
 0x294   : > { %5243 = vst [vmem:[%s7201_s17 + $0x90] sm:$0xff] %v5897_v58  ;;  %5244 = vst [vmem:[%s7201_s17 + $0x98] sm:$0xff] %v5898_v59 }
 0x296   : > { %v2711_v60 = vpop.f32.mrb[20].mxu0  ;;  %v3417_v61 = vpop.f32.mrb[20].mxu1 }
 0x297   : > { %v2713_v62 = vpop.f32.mrb[21].mxu0  ;;  %v3419_v63 = vpop.f32.mrb[21].mxu1 }
 0x298   : > { %v5899_v0 = vpack.c.bf16 %v2713_v62, %v2711_v60  ;;  %v5900_v1 = vpack.c.bf16 %v3419_v63, %v3417_v61  ;;  %v2715_v2 = vpop.f32.mrb[22].mxu0  ;;  %v3421_v3 = vpop.f32.mrb[22].mxu1 }
 0x299   : > { %v2717_v4 = vpop.f32.mrb[23].mxu0  ;;  %v3423_v5 = vpop.f32.mrb[23].mxu1 }
 0x29a   : > { %5245 = vst [vmem:[%s7201_s17 + $0xa0] sm:$0xff] %v5899_v0  ;;  %5246 = vst [vmem:[%s7201_s17 + $0xa8] sm:$0xff] %v5900_v1  ;;  %v5901_v6 = vpack.c.bf16 %v2717_v4, %v2715_v2  ;;  %v5902_v7 = vpack.c.bf16 %v3423_v5, %v3421_v3 }
 0x29c   : > { %5247 = vst [vmem:[%s7201_s17 + $0xb0] sm:$0xff] %v5901_v6  ;;  %5248 = vst [vmem:[%s7201_s17 + $0xb8] sm:$0xff] %v5902_v7 }
 0x29e   : > { %v2721_v8 = vpop.f32.mrb[24].mxu0  ;;  %v3427_v9 = vpop.f32.mrb[24].mxu1 }
 0x29f   : > { %v2723_v10 = vpop.f32.mrb[25].mxu0  ;;  %v3429_v11 = vpop.f32.mrb[25].mxu1 }
 0x2a0   : > { %v5903_v12 = vpack.c.bf16 %v2723_v10, %v2721_v8  ;;  %v5904_v13 = vpack.c.bf16 %v3429_v11, %v3427_v9  ;;  %v2725_v14 = vpop.f32.mrb[26].mxu0  ;;  %v3431_v15 = vpop.f32.mrb[26].mxu1 }
 0x2a1   : > { %v2727_v16 = vpop.f32.mrb[27].mxu0  ;;  %v3433_v17 = vpop.f32.mrb[27].mxu1 }
 0x2a2   : > { %5249 = vst [vmem:[%s7201_s17 + $0xc0] sm:$0xff] %v5903_v12  ;;  %5250 = vst [vmem:[%s7201_s17 + $0xc8] sm:$0xff] %v5904_v13  ;;  %v5905_v18 = vpack.c.bf16 %v2727_v16, %v2725_v14  ;;  %v5906_v19 = vpack.c.bf16 %v3433_v17, %v3431_v15 }
 0x2a4   : > { %5251 = vst [vmem:[%s7201_s17 + $0xd0] sm:$0xff] %v5905_v18  ;;  %5252 = vst [vmem:[%s7201_s17 + $0xd8] sm:$0xff] %v5906_v19 }
 0x2a6   : > { %v2731_v20 = vpop.f32.mrb[28].mxu0  ;;  %v3437_v21 = vpop.f32.mrb[28].mxu1 }
 0x2a7   : > { %v2733_v22 = vpop.f32.mrb[29].mxu0  ;;  %v3439_v23 = vpop.f32.mrb[29].mxu1 }
 0x2a8   : > { %v5907_v24 = vpack.c.bf16 %v2733_v22, %v2731_v20  ;;  %v5908_v25 = vpack.c.bf16 %v3439_v23, %v3437_v21  ;;  %v2735_v26 = vpop.f32.mrb[30].mxu0  ;;  %v3441_v27 = vpop.f32.mrb[30].mxu1 }
 0x2a9   : > { %v2737_v28 = vpop.f32.mrb[31].mxu0  ;;  %v3443_v29 = vpop.f32.mrb[31].mxu1 }
 0x2aa   : > { %5253 = vst [vmem:[%s7201_s17 + $0xe0] sm:$0xff] %v5907_v24  ;;  %5254 = vst [vmem:[%s7201_s17 + $0xe8] sm:$0xff] %v5908_v25  ;;  %v5909_v30 = vpack.c.bf16 %v2737_v28, %v2735_v26  ;;  %v5910_v31 = vpack.c.bf16 %v3443_v29, %v3441_v27 }
 0x2ac   : > { %5255 = vst [vmem:[%s7201_s17 + $0xf0] sm:$0xff] %v5909_v30  ;;  %5256 = vst [vmem:[%s7201_s17 + $0xf8] sm:$0xff] %v5910_v31 }
 0x2ae   : > { %v2741_v32 = vpop.f32.mrb[32].mxu0  ;;  %v3447_v33 = vpop.f32.mrb[32].mxu1 }
 0x2af   : > { %v2743_v34 = vpop.f32.mrb[33].mxu0  ;;  %v3449_v35 = vpop.f32.mrb[33].mxu1 }
 0x2b0   : > { %v5911_v36 = vpack.c.bf16 %v2743_v34, %v2741_v32  ;;  %v5912_v37 = vpack.c.bf16 %v3449_v35, %v3447_v33  ;;  %v2745_v38 = vpop.f32.mrb[34].mxu0  ;;  %v3451_v39 = vpop.f32.mrb[34].mxu1 }
 0x2b1   : > { %v2747_v40 = vpop.f32.mrb[35].mxu0  ;;  %v3453_v41 = vpop.f32.mrb[35].mxu1 }
 0x2b2   : > { %5257 = vst [vmem:[%s7201_s17 + $0x100] sm:$0xff] %v5911_v36  ;;  %5258 = vst [vmem:[%s7201_s17 + $0x108] sm:$0xff] %v5912_v37  ;;  %v5913_v42 = vpack.c.bf16 %v2747_v40, %v2745_v38  ;;  %v5914_v43 = vpack.c.bf16 %v3453_v41, %v3451_v39 }
 0x2b4   : > { %5259 = vst [vmem:[%s7201_s17 + $0x110] sm:$0xff] %v5913_v42  ;;  %5260 = vst [vmem:[%s7201_s17 + $0x118] sm:$0xff] %v5914_v43 }
 0x2b6   : > { %v2751_v44 = vpop.f32.mrb[36].mxu0  ;;  %v3457_v45 = vpop.f32.mrb[36].mxu1 }
 0x2b7   : > { %v2753_v46 = vpop.f32.mrb[37].mxu0  ;;  %v3459_v47 = vpop.f32.mrb[37].mxu1 }
 0x2b8   : > { %v5915_v48 = vpack.c.bf16 %v2753_v46, %v2751_v44  ;;  %v5916_v49 = vpack.c.bf16 %v3459_v47, %v3457_v45  ;;  %v2755_v50 = vpop.f32.mrb[38].mxu0  ;;  %v3461_v51 = vpop.f32.mrb[38].mxu1 }
 0x2b9   : > { %v2757_v52 = vpop.f32.mrb[39].mxu0  ;;  %v3463_v53 = vpop.f32.mrb[39].mxu1 }
 0x2ba   : > { %5261 = vst [vmem:[%s7201_s17 + $0x120] sm:$0xff] %v5915_v48  ;;  %5262 = vst [vmem:[%s7201_s17 + $0x128] sm:$0xff] %v5916_v49  ;;  %v5917_v54 = vpack.c.bf16 %v2757_v52, %v2755_v50  ;;  %v5918_v55 = vpack.c.bf16 %v3463_v53, %v3461_v51 }
 0x2bc   : > { %5263 = vst [vmem:[%s7201_s17 + $0x130] sm:$0xff] %v5917_v54  ;;  %5264 = vst [vmem:[%s7201_s17 + $0x138] sm:$0xff] %v5918_v55 }
 0x2be   : > { %v2761_v56 = vpop.f32.mrb[40].mxu0  ;;  %v3467_v57 = vpop.f32.mrb[40].mxu1 }
 0x2bf   : > { %v2763_v58 = vpop.f32.mrb[41].mxu0  ;;  %v3469_v59 = vpop.f32.mrb[41].mxu1 }
 0x2c0   : > { %v5919_v60 = vpack.c.bf16 %v2763_v58, %v2761_v56  ;;  %v5920_v61 = vpack.c.bf16 %v3469_v59, %v3467_v57  ;;  %v2765_v62 = vpop.f32.mrb[42].mxu0  ;;  %v3471_v63 = vpop.f32.mrb[42].mxu1 }
 0x2c1   : > { %v2767_v0 = vpop.f32.mrb[43].mxu0  ;;  %v3473_v1 = vpop.f32.mrb[43].mxu1 }
 0x2c2   : > { %5265 = vst [vmem:[%s7201_s17 + $0x140] sm:$0xff] %v5919_v60  ;;  %5266 = vst [vmem:[%s7201_s17 + $0x148] sm:$0xff] %v5920_v61  ;;  %v5921_v2 = vpack.c.bf16 %v2767_v0, %v2765_v62  ;;  %v5922_v3 = vpack.c.bf16 %v3473_v1, %v3471_v63 }
 0x2c4   : > { %5267 = vst [vmem:[%s7201_s17 + $0x150] sm:$0xff] %v5921_v2  ;;  %5268 = vst [vmem:[%s7201_s17 + $0x158] sm:$0xff] %v5922_v3 }
 0x2c6   : > { %v2771_v4 = vpop.f32.mrb[44].mxu0  ;;  %v3477_v5 = vpop.f32.mrb[44].mxu1 }
 0x2c7   : > { %v2773_v6 = vpop.f32.mrb[45].mxu0  ;;  %v3479_v7 = vpop.f32.mrb[45].mxu1 }
 0x2c8   : > { %v5923_v8 = vpack.c.bf16 %v2773_v6, %v2771_v4  ;;  %v5924_v9 = vpack.c.bf16 %v3479_v7, %v3477_v5  ;;  %v2775_v10 = vpop.f32.mrb[46].mxu0  ;;  %v3481_v11 = vpop.f32.mrb[46].mxu1 }
 0x2c9   : > { %v2777_v12 = vpop.f32.mrb[47].mxu0  ;;  %v3483_v13 = vpop.f32.mrb[47].mxu1 }
 0x2ca   : > { %5269 = vst [vmem:[%s7201_s17 + $0x160] sm:$0xff] %v5923_v8  ;;  %5270 = vst [vmem:[%s7201_s17 + $0x168] sm:$0xff] %v5924_v9  ;;  %v5925_v14 = vpack.c.bf16 %v2777_v12, %v2775_v10  ;;  %v5926_v15 = vpack.c.bf16 %v3483_v13, %v3481_v11 }
 0x2cc   : > { %5271 = vst [vmem:[%s7201_s17 + $0x170] sm:$0xff] %v5925_v14  ;;  %5272 = vst [vmem:[%s7201_s17 + $0x178] sm:$0xff] %v5926_v15 }
 0x2ce   : > { %v2781_v16 = vpop.f32.mrb[48].mxu0  ;;  %v3487_v17 = vpop.f32.mrb[48].mxu1 }
 0x2cf   : > { %v2783_v18 = vpop.f32.mrb[49].mxu0  ;;  %v3489_v19 = vpop.f32.mrb[49].mxu1 }
 0x2d0   : > { %v5927_v20 = vpack.c.bf16 %v2783_v18, %v2781_v16  ;;  %v5928_v21 = vpack.c.bf16 %v3489_v19, %v3487_v17  ;;  %v2785_v22 = vpop.f32.mrb[50].mxu0  ;;  %v3491_v23 = vpop.f32.mrb[50].mxu1 }
 0x2d1   : > { %v2787_v24 = vpop.f32.mrb[51].mxu0  ;;  %v3493_v25 = vpop.f32.mrb[51].mxu1 }
 0x2d2   : > { %5273 = vst [vmem:[%s7201_s17 + $0x180] sm:$0xff] %v5927_v20  ;;  %5274 = vst [vmem:[%s7201_s17 + $0x188] sm:$0xff] %v5928_v21  ;;  %v5929_v26 = vpack.c.bf16 %v2787_v24, %v2785_v22  ;;  %v5930_v27 = vpack.c.bf16 %v3493_v25, %v3491_v23 }
 0x2d4   : > { %5275 = vst [vmem:[%s7201_s17 + $0x190] sm:$0xff] %v5929_v26  ;;  %5276 = vst [vmem:[%s7201_s17 + $0x198] sm:$0xff] %v5930_v27 }
 0x2d6   : > { %v2791_v28 = vpop.f32.mrb[52].mxu0  ;;  %v3497_v29 = vpop.f32.mrb[52].mxu1 }
 0x2d7   : > { %v2793_v30 = vpop.f32.mrb[53].mxu0  ;;  %v3499_v31 = vpop.f32.mrb[53].mxu1 }
 0x2d8   : > { %v5931_v32 = vpack.c.bf16 %v2793_v30, %v2791_v28  ;;  %v5932_v33 = vpack.c.bf16 %v3499_v31, %v3497_v29  ;;  %v2795_v34 = vpop.f32.mrb[54].mxu0  ;;  %v3501_v35 = vpop.f32.mrb[54].mxu1 }
 0x2d9   : > { %v2797_v36 = vpop.f32.mrb[55].mxu0  ;;  %v3503_v37 = vpop.f32.mrb[55].mxu1 }
 0x2da   : > { %5277 = vst [vmem:[%s7201_s17 + $0x1a0] sm:$0xff] %v5931_v32  ;;  %5278 = vst [vmem:[%s7201_s17 + $0x1a8] sm:$0xff] %v5932_v33  ;;  %v5933_v38 = vpack.c.bf16 %v2797_v36, %v2795_v34  ;;  %v5934_v39 = vpack.c.bf16 %v3503_v37, %v3501_v35 }
 0x2dc   : > { %5279 = vst [vmem:[%s7201_s17 + $0x1b0] sm:$0xff] %v5933_v38  ;;  %5280 = vst [vmem:[%s7201_s17 + $0x1b8] sm:$0xff] %v5934_v39 }
 0x2de   : > { %v2801_v40 = vpop.f32.mrb[56].mxu0  ;;  %v3507_v41 = vpop.f32.mrb[56].mxu1 }
 0x2df   : > { %v2803_v42 = vpop.f32.mrb[57].mxu0  ;;  %v3509_v43 = vpop.f32.mrb[57].mxu1 }
 0x2e0   : > { %v5935_v44 = vpack.c.bf16 %v2803_v42, %v2801_v40  ;;  %v5936_v45 = vpack.c.bf16 %v3509_v43, %v3507_v41  ;;  %v2805_v46 = vpop.f32.mrb[58].mxu0  ;;  %v3511_v47 = vpop.f32.mrb[58].mxu1 }
 0x2e1   : > { %v2807_v48 = vpop.f32.mrb[59].mxu0  ;;  %v3513_v49 = vpop.f32.mrb[59].mxu1 }
 0x2e2   : > { %5281 = vst [vmem:[%s7201_s17 + $0x1c0] sm:$0xff] %v5935_v44  ;;  %5282 = vst [vmem:[%s7201_s17 + $0x1c8] sm:$0xff] %v5936_v45  ;;  %v5937_v50 = vpack.c.bf16 %v2807_v48, %v2805_v46  ;;  %v5938_v51 = vpack.c.bf16 %v3513_v49, %v3511_v47 }
 0x2e4   : > { %5283 = vst [vmem:[%s7201_s17 + $0x1d0] sm:$0xff] %v5937_v50  ;;  %5284 = vst [vmem:[%s7201_s17 + $0x1d8] sm:$0xff] %v5938_v51 }
 0x2e6   : > { %v2811_v52 = vpop.f32.mrb[60].mxu0  ;;  %v3517_v53 = vpop.f32.mrb[60].mxu1 }
 0x2e7   : > { %v2813_v54 = vpop.f32.mrb[61].mxu0  ;;  %v3519_v55 = vpop.f32.mrb[61].mxu1 }
 0x2e8   : > { %v5939_v56 = vpack.c.bf16 %v2813_v54, %v2811_v52  ;;  %v5940_v57 = vpack.c.bf16 %v3519_v55, %v3517_v53  ;;  %v2815_v58 = vpop.f32.mrb[62].mxu0  ;;  %v3521_v59 = vpop.f32.mrb[62].mxu1 }
 0x2e9   : > { %v2817_v60 = vpop.f32.mrb[63].mxu0  ;;  %v3523_v61 = vpop.f32.mrb[63].mxu1 }
 0x2ea   : > { %5285 = vst [vmem:[%s7201_s17 + $0x1e0] sm:$0xff] %v5939_v56  ;;  %5286 = vst [vmem:[%s7201_s17 + $0x1e8] sm:$0xff] %v5940_v57  ;;  %v5941_v62 = vpack.c.bf16 %v2817_v60, %v2815_v58  ;;  %v5942_v63 = vpack.c.bf16 %v3523_v61, %v3521_v59 }
 0x2ec   : > { %5287 = vst [vmem:[%s7201_s17 + $0x1f0] sm:$0xff] %v5941_v62  ;;  %5288 = vst [vmem:[%s7201_s17 + $0x1f8] sm:$0xff] %v5942_v63 }
 0x2ee   : > { %v2821_v0 = vpop.f32.mrb[64].mxu0  ;;  %v3527_v1 = vpop.f32.mrb[64].mxu1 }
 0x2ef   : > { %v2823_v2 = vpop.f32.mrb[65].mxu0  ;;  %v3529_v3 = vpop.f32.mrb[65].mxu1 }
 0x2f0   : > { %v5943_v4 = vpack.c.bf16 %v2823_v2, %v2821_v0  ;;  %v5944_v5 = vpack.c.bf16 %v3529_v3, %v3527_v1  ;;  %v2825_v6 = vpop.f32.mrb[66].mxu0  ;;  %v3531_v7 = vpop.f32.mrb[66].mxu1 }
 0x2f1   : > { %v2827_v8 = vpop.f32.mrb[67].mxu0  ;;  %v3533_v9 = vpop.f32.mrb[67].mxu1 }
 0x2f2   : > { %5289 = vst [vmem:[%s7201_s17 + $0x200] sm:$0xff] %v5943_v4  ;;  %5290 = vst [vmem:[%s7201_s17 + $0x208] sm:$0xff] %v5944_v5  ;;  %v5945_v10 = vpack.c.bf16 %v2827_v8, %v2825_v6  ;;  %v5946_v11 = vpack.c.bf16 %v3533_v9, %v3531_v7 }
 0x2f4   : > { %5291 = vst [vmem:[%s7201_s17 + $0x210] sm:$0xff] %v5945_v10  ;;  %5292 = vst [vmem:[%s7201_s17 + $0x218] sm:$0xff] %v5946_v11 }
 0x2f6   : > { %v2831_v12 = vpop.f32.mrb[68].mxu0  ;;  %v3537_v13 = vpop.f32.mrb[68].mxu1 }
 0x2f7   : > { %v2833_v14 = vpop.f32.mrb[69].mxu0  ;;  %v3539_v15 = vpop.f32.mrb[69].mxu1 }
 0x2f8   : > { %v5947_v16 = vpack.c.bf16 %v2833_v14, %v2831_v12  ;;  %v5948_v17 = vpack.c.bf16 %v3539_v15, %v3537_v13  ;;  %v2835_v18 = vpop.f32.mrb[70].mxu0  ;;  %v3541_v19 = vpop.f32.mrb[70].mxu1 }
 0x2f9   : > { %v2837_v20 = vpop.f32.mrb[71].mxu0  ;;  %v3543_v21 = vpop.f32.mrb[71].mxu1 }
 0x2fa   : > { %5293 = vst [vmem:[%s7201_s17 + $0x220] sm:$0xff] %v5947_v16  ;;  %5294 = vst [vmem:[%s7201_s17 + $0x228] sm:$0xff] %v5948_v17  ;;  %v5949_v22 = vpack.c.bf16 %v2837_v20, %v2835_v18  ;;  %v5950_v23 = vpack.c.bf16 %v3543_v21, %v3541_v19 }
 0x2fc   : > { %5295 = vst [vmem:[%s7201_s17 + $0x230] sm:$0xff] %v5949_v22  ;;  %5296 = vst [vmem:[%s7201_s17 + $0x238] sm:$0xff] %v5950_v23 }
 0x2fe   : > { %v2841_v24 = vpop.f32.mrb[72].mxu0  ;;  %v3547_v25 = vpop.f32.mrb[72].mxu1 }
 0x2ff   : > { %v2843_v26 = vpop.f32.mrb[73].mxu0  ;;  %v3549_v27 = vpop.f32.mrb[73].mxu1 }
 0x300   : > { %v5951_v28 = vpack.c.bf16 %v2843_v26, %v2841_v24  ;;  %v5952_v29 = vpack.c.bf16 %v3549_v27, %v3547_v25  ;;  %v2845_v30 = vpop.f32.mrb[74].mxu0  ;;  %v3551_v31 = vpop.f32.mrb[74].mxu1 }
 0x301   : > { %v2847_v32 = vpop.f32.mrb[75].mxu0  ;;  %v3553_v33 = vpop.f32.mrb[75].mxu1 }
 0x302   : > { %5297 = vst [vmem:[%s7201_s17 + $0x240] sm:$0xff] %v5951_v28  ;;  %5298 = vst [vmem:[%s7201_s17 + $0x248] sm:$0xff] %v5952_v29  ;;  %v5953_v34 = vpack.c.bf16 %v2847_v32, %v2845_v30  ;;  %v5954_v35 = vpack.c.bf16 %v3553_v33, %v3551_v31 }
 0x304   : > { %5299 = vst [vmem:[%s7201_s17 + $0x250] sm:$0xff] %v5953_v34  ;;  %5300 = vst [vmem:[%s7201_s17 + $0x258] sm:$0xff] %v5954_v35 }
 0x306   : > { %v2851_v36 = vpop.f32.mrb[76].mxu0  ;;  %v3557_v37 = vpop.f32.mrb[76].mxu1 }
 0x307   : > { %v2853_v38 = vpop.f32.mrb[77].mxu0  ;;  %v3559_v39 = vpop.f32.mrb[77].mxu1 }
 0x308   : > { %v5955_v40 = vpack.c.bf16 %v2853_v38, %v2851_v36  ;;  %v5956_v41 = vpack.c.bf16 %v3559_v39, %v3557_v37  ;;  %v2855_v42 = vpop.f32.mrb[78].mxu0  ;;  %v3561_v43 = vpop.f32.mrb[78].mxu1 }
 0x309   : > { %v2857_v44 = vpop.f32.mrb[79].mxu0  ;;  %v3563_v45 = vpop.f32.mrb[79].mxu1 }
 0x30a   : > { %5301 = vst [vmem:[%s7201_s17 + $0x260] sm:$0xff] %v5955_v40  ;;  %5302 = vst [vmem:[%s7201_s17 + $0x268] sm:$0xff] %v5956_v41  ;;  %v5957_v46 = vpack.c.bf16 %v2857_v44, %v2855_v42  ;;  %v5958_v47 = vpack.c.bf16 %v3563_v45, %v3561_v43 }
 0x30c   : > { %5303 = vst [vmem:[%s7201_s17 + $0x270] sm:$0xff] %v5957_v46  ;;  %5304 = vst [vmem:[%s7201_s17 + $0x278] sm:$0xff] %v5958_v47 }
 0x30e   : > { %v2861_v48 = vpop.f32.mrb[80].mxu0  ;;  %v3567_v49 = vpop.f32.mrb[80].mxu1 }
 0x30f   : > { %v2863_v50 = vpop.f32.mrb[81].mxu0  ;;  %v3569_v51 = vpop.f32.mrb[81].mxu1 }
 0x310   : > { %v5959_v52 = vpack.c.bf16 %v2863_v50, %v2861_v48  ;;  %v5960_v53 = vpack.c.bf16 %v3569_v51, %v3567_v49  ;;  %v2865_v54 = vpop.f32.mrb[82].mxu0  ;;  %v3571_v55 = vpop.f32.mrb[82].mxu1 }
 0x311   : > { %v2867_v56 = vpop.f32.mrb[83].mxu0  ;;  %v3573_v57 = vpop.f32.mrb[83].mxu1 }
 0x312   : > { %5305 = vst [vmem:[%s7201_s17 + $0x280] sm:$0xff] %v5959_v52  ;;  %5306 = vst [vmem:[%s7201_s17 + $0x288] sm:$0xff] %v5960_v53  ;;  %v5961_v58 = vpack.c.bf16 %v2867_v56, %v2865_v54  ;;  %v5962_v59 = vpack.c.bf16 %v3573_v57, %v3571_v55 }
 0x314   : > { %5307 = vst [vmem:[%s7201_s17 + $0x290] sm:$0xff] %v5961_v58  ;;  %5308 = vst [vmem:[%s7201_s17 + $0x298] sm:$0xff] %v5962_v59 }
 0x316   : > { %v2871_v60 = vpop.f32.mrb[84].mxu0  ;;  %v3577_v61 = vpop.f32.mrb[84].mxu1 }
 0x317   : > { %v2873_v62 = vpop.f32.mrb[85].mxu0  ;;  %v3579_v63 = vpop.f32.mrb[85].mxu1 }
 0x318   : > { %v5963_v0 = vpack.c.bf16 %v2873_v62, %v2871_v60  ;;  %v5964_v1 = vpack.c.bf16 %v3579_v63, %v3577_v61  ;;  %v2875_v2 = vpop.f32.mrb[86].mxu0  ;;  %v3581_v3 = vpop.f32.mrb[86].mxu1 }
 0x319   : > { %v2877_v4 = vpop.f32.mrb[87].mxu0  ;;  %v3583_v5 = vpop.f32.mrb[87].mxu1 }
 0x31a   : > { %5309 = vst [vmem:[%s7201_s17 + $0x2a0] sm:$0xff] %v5963_v0  ;;  %5310 = vst [vmem:[%s7201_s17 + $0x2a8] sm:$0xff] %v5964_v1  ;;  %v5965_v6 = vpack.c.bf16 %v2877_v4, %v2875_v2  ;;  %v5966_v7 = vpack.c.bf16 %v3583_v5, %v3581_v3 }
 0x31c   : > { %5311 = vst [vmem:[%s7201_s17 + $0x2b0] sm:$0xff] %v5965_v6  ;;  %5312 = vst [vmem:[%s7201_s17 + $0x2b8] sm:$0xff] %v5966_v7 }
 0x31e   : > { %v2881_v8 = vpop.f32.mrb[88].mxu0  ;;  %v3587_v9 = vpop.f32.mrb[88].mxu1 }
 0x31f   : > { %v2883_v10 = vpop.f32.mrb[89].mxu0  ;;  %v3589_v11 = vpop.f32.mrb[89].mxu1 }
 0x320   : > { %v5967_v12 = vpack.c.bf16 %v2883_v10, %v2881_v8  ;;  %v5968_v13 = vpack.c.bf16 %v3589_v11, %v3587_v9  ;;  %v2885_v14 = vpop.f32.mrb[90].mxu0  ;;  %v3591_v15 = vpop.f32.mrb[90].mxu1 }
 0x321   : > { %v2887_v16 = vpop.f32.mrb[91].mxu0  ;;  %v3593_v17 = vpop.f32.mrb[91].mxu1 }
 0x322   : > { %5313 = vst [vmem:[%s7201_s17 + $0x2c0] sm:$0xff] %v5967_v12  ;;  %5314 = vst [vmem:[%s7201_s17 + $0x2c8] sm:$0xff] %v5968_v13  ;;  %v5969_v18 = vpack.c.bf16 %v2887_v16, %v2885_v14  ;;  %v5970_v19 = vpack.c.bf16 %v3593_v17, %v3591_v15 }
 0x324   : > { %5315 = vst [vmem:[%s7201_s17 + $0x2d0] sm:$0xff] %v5969_v18  ;;  %5316 = vst [vmem:[%s7201_s17 + $0x2d8] sm:$0xff] %v5970_v19 }
 0x326   : > { %v2891_v20 = vpop.f32.mrb[92].mxu0  ;;  %v3597_v21 = vpop.f32.mrb[92].mxu1 }
 0x327   : > { %v2893_v22 = vpop.f32.mrb[93].mxu0  ;;  %v3599_v23 = vpop.f32.mrb[93].mxu1 }
 0x328   : > { %v5971_v24 = vpack.c.bf16 %v2893_v22, %v2891_v20  ;;  %v5972_v25 = vpack.c.bf16 %v3599_v23, %v3597_v21  ;;  %v2895_v26 = vpop.f32.mrb[94].mxu0  ;;  %v3601_v27 = vpop.f32.mrb[94].mxu1 }
 0x329   : > { %v2897_v28 = vpop.f32.mrb[95].mxu0  ;;  %v3603_v29 = vpop.f32.mrb[95].mxu1 }
 0x32a   : > { %5317 = vst [vmem:[%s7201_s17 + $0x2e0] sm:$0xff] %v5971_v24  ;;  %5318 = vst [vmem:[%s7201_s17 + $0x2e8] sm:$0xff] %v5972_v25  ;;  %v5973_v30 = vpack.c.bf16 %v2897_v28, %v2895_v26  ;;  %v5974_v31 = vpack.c.bf16 %v3603_v29, %v3601_v27 }
 0x32c   : > { %5319 = vst [vmem:[%s7201_s17 + $0x2f0] sm:$0xff] %v5973_v30  ;;  %5320 = vst [vmem:[%s7201_s17 + $0x2f8] sm:$0xff] %v5974_v31 }
 0x32e   : > { %v2901_v32 = vpop.f32.mrb[96].mxu0  ;;  %v3607_v33 = vpop.f32.mrb[96].mxu1 }
 0x32f   : > { %v2903_v34 = vpop.f32.mrb[97].mxu0  ;;  %v3609_v35 = vpop.f32.mrb[97].mxu1 }
 0x330   : > { %v5975_v36 = vpack.c.bf16 %v2903_v34, %v2901_v32  ;;  %v5976_v37 = vpack.c.bf16 %v3609_v35, %v3607_v33  ;;  %v2905_v38 = vpop.f32.mrb[98].mxu0  ;;  %v3611_v39 = vpop.f32.mrb[98].mxu1 }
 0x331   : > { %v2907_v40 = vpop.f32.mrb[99].mxu0  ;;  %v3613_v41 = vpop.f32.mrb[99].mxu1 }
 0x332   : > { %5321 = vst [vmem:[%s7201_s17 + $0x300] sm:$0xff] %v5975_v36  ;;  %5322 = vst [vmem:[%s7201_s17 + $0x308] sm:$0xff] %v5976_v37  ;;  %v5977_v42 = vpack.c.bf16 %v2907_v40, %v2905_v38  ;;  %v5978_v43 = vpack.c.bf16 %v3613_v41, %v3611_v39 }
 0x334   : > { %5323 = vst [vmem:[%s7201_s17 + $0x310] sm:$0xff] %v5977_v42  ;;  %5324 = vst [vmem:[%s7201_s17 + $0x318] sm:$0xff] %v5978_v43 }
 0x336   : > { %v2911_v44 = vpop.f32.mrb[100].mxu0  ;;  %v3617_v45 = vpop.f32.mrb[100].mxu1 }
 0x337   : > { %v2913_v46 = vpop.f32.mrb[101].mxu0  ;;  %v3619_v47 = vpop.f32.mrb[101].mxu1 }
 0x338   : > { %v5979_v48 = vpack.c.bf16 %v2913_v46, %v2911_v44  ;;  %v5980_v49 = vpack.c.bf16 %v3619_v47, %v3617_v45  ;;  %v2915_v50 = vpop.f32.mrb[102].mxu0  ;;  %v3621_v51 = vpop.f32.mrb[102].mxu1 }
 0x339   : > { %v2917_v52 = vpop.f32.mrb[103].mxu0  ;;  %v3623_v53 = vpop.f32.mrb[103].mxu1 }
 0x33a   : > { %5325 = vst [vmem:[%s7201_s17 + $0x320] sm:$0xff] %v5979_v48  ;;  %5326 = vst [vmem:[%s7201_s17 + $0x328] sm:$0xff] %v5980_v49  ;;  %v5981_v54 = vpack.c.bf16 %v2917_v52, %v2915_v50  ;;  %v5982_v55 = vpack.c.bf16 %v3623_v53, %v3621_v51 }
 0x33c   : > { %5327 = vst [vmem:[%s7201_s17 + $0x330] sm:$0xff] %v5981_v54  ;;  %5328 = vst [vmem:[%s7201_s17 + $0x338] sm:$0xff] %v5982_v55 }
 0x33e   : > { %v2921_v56 = vpop.f32.mrb[104].mxu0  ;;  %v3627_v57 = vpop.f32.mrb[104].mxu1 }
 0x33f   : > { %v2923_v58 = vpop.f32.mrb[105].mxu0  ;;  %v3629_v59 = vpop.f32.mrb[105].mxu1 }
 0x340   : > { %v5983_v60 = vpack.c.bf16 %v2923_v58, %v2921_v56  ;;  %v5984_v61 = vpack.c.bf16 %v3629_v59, %v3627_v57  ;;  %v2925_v62 = vpop.f32.mrb[106].mxu0  ;;  %v3631_v63 = vpop.f32.mrb[106].mxu1 }
 0x341   : > { %v2927_v0 = vpop.f32.mrb[107].mxu0  ;;  %v3633_v1 = vpop.f32.mrb[107].mxu1 }
 0x342   : > { %5329 = vst [vmem:[%s7201_s17 + $0x340] sm:$0xff] %v5983_v60  ;;  %5330 = vst [vmem:[%s7201_s17 + $0x348] sm:$0xff] %v5984_v61  ;;  %v5985_v2 = vpack.c.bf16 %v2927_v0, %v2925_v62  ;;  %v5986_v3 = vpack.c.bf16 %v3633_v1, %v3631_v63 }
 0x344   : > { %5331 = vst [vmem:[%s7201_s17 + $0x350] sm:$0xff] %v5985_v2  ;;  %5332 = vst [vmem:[%s7201_s17 + $0x358] sm:$0xff] %v5986_v3 }
 0x346   : > { %v2931_v4 = vpop.f32.mrb[108].mxu0  ;;  %v3637_v5 = vpop.f32.mrb[108].mxu1 }
 0x347   : > { %v2933_v6 = vpop.f32.mrb[109].mxu0  ;;  %v3639_v7 = vpop.f32.mrb[109].mxu1 }
 0x348   : > { %v5987_v8 = vpack.c.bf16 %v2933_v6, %v2931_v4  ;;  %v5988_v9 = vpack.c.bf16 %v3639_v7, %v3637_v5  ;;  %v2935_v10 = vpop.f32.mrb[110].mxu0  ;;  %v3641_v11 = vpop.f32.mrb[110].mxu1 }
 0x349   : > { %v2937_v12 = vpop.f32.mrb[111].mxu0  ;;  %v3643_v13 = vpop.f32.mrb[111].mxu1 }
 0x34a   : > { %5333 = vst [vmem:[%s7201_s17 + $0x360] sm:$0xff] %v5987_v8  ;;  %5334 = vst [vmem:[%s7201_s17 + $0x368] sm:$0xff] %v5988_v9  ;;  %v5989_v14 = vpack.c.bf16 %v2937_v12, %v2935_v10  ;;  %v5990_v15 = vpack.c.bf16 %v3643_v13, %v3641_v11 }
 0x34c   : > { %5335 = vst [vmem:[%s7201_s17 + $0x370] sm:$0xff] %v5989_v14  ;;  %5336 = vst [vmem:[%s7201_s17 + $0x378] sm:$0xff] %v5990_v15 }
 0x34e   : > { %v2941_v16 = vpop.f32.mrb[112].mxu0  ;;  %v3647_v17 = vpop.f32.mrb[112].mxu1 }
 0x34f   : > { %v2943_v18 = vpop.f32.mrb[113].mxu0  ;;  %v3649_v19 = vpop.f32.mrb[113].mxu1 }
 0x350   : > { %v5991_v20 = vpack.c.bf16 %v2943_v18, %v2941_v16  ;;  %v5992_v21 = vpack.c.bf16 %v3649_v19, %v3647_v17  ;;  %v2945_v22 = vpop.f32.mrb[114].mxu0  ;;  %v3651_v23 = vpop.f32.mrb[114].mxu1 }
 0x351   : > { %v2947_v24 = vpop.f32.mrb[115].mxu0  ;;  %v3653_v25 = vpop.f32.mrb[115].mxu1 }
 0x352   : > { %5337 = vst [vmem:[%s7201_s17 + $0x380] sm:$0xff] %v5991_v20  ;;  %5338 = vst [vmem:[%s7201_s17 + $0x388] sm:$0xff] %v5992_v21  ;;  %v5993_v26 = vpack.c.bf16 %v2947_v24, %v2945_v22  ;;  %v5994_v27 = vpack.c.bf16 %v3653_v25, %v3651_v23 }
 0x354   : > { %5339 = vst [vmem:[%s7201_s17 + $0x390] sm:$0xff] %v5993_v26  ;;  %5340 = vst [vmem:[%s7201_s17 + $0x398] sm:$0xff] %v5994_v27 }
 0x356   : > { %v2951_v28 = vpop.f32.mrb[116].mxu0  ;;  %v3657_v29 = vpop.f32.mrb[116].mxu1 }
 0x357   : > { %v2953_v30 = vpop.f32.mrb[117].mxu0  ;;  %v3659_v31 = vpop.f32.mrb[117].mxu1 }
 0x358   : > { %v5995_v32 = vpack.c.bf16 %v2953_v30, %v2951_v28  ;;  %v5996_v33 = vpack.c.bf16 %v3659_v31, %v3657_v29  ;;  %v2955_v34 = vpop.f32.mrb[118].mxu0  ;;  %v3661_v35 = vpop.f32.mrb[118].mxu1 }
 0x359   : > { %v2957_v36 = vpop.f32.mrb[119].mxu0  ;;  %v3663_v37 = vpop.f32.mrb[119].mxu1 }
 0x35a   : > { %5341 = vst [vmem:[%s7201_s17 + $0x3a0] sm:$0xff] %v5995_v32  ;;  %5342 = vst [vmem:[%s7201_s17 + $0x3a8] sm:$0xff] %v5996_v33  ;;  %v5997_v38 = vpack.c.bf16 %v2957_v36, %v2955_v34  ;;  %v5998_v39 = vpack.c.bf16 %v3663_v37, %v3661_v35 }
 0x35c   : > { %5343 = vst [vmem:[%s7201_s17 + $0x3b0] sm:$0xff] %v5997_v38  ;;  %5344 = vst [vmem:[%s7201_s17 + $0x3b8] sm:$0xff] %v5998_v39 }
 0x35e   : > { %v2961_v40 = vpop.f32.mrb[120].mxu0  ;;  %v3667_v41 = vpop.f32.mrb[120].mxu1 }
 0x35f   : > { %v2963_v42 = vpop.f32.mrb[121].mxu0  ;;  %v3669_v43 = vpop.f32.mrb[121].mxu1 }
 0x360   : > { %v5999_v44 = vpack.c.bf16 %v2963_v42, %v2961_v40  ;;  %v6000_v45 = vpack.c.bf16 %v3669_v43, %v3667_v41  ;;  %v2965_v46 = vpop.f32.mrb[122].mxu0  ;;  %v3671_v47 = vpop.f32.mrb[122].mxu1 }
 0x361   : > { %v2967_v48 = vpop.f32.mrb[123].mxu0  ;;  %v3673_v49 = vpop.f32.mrb[123].mxu1 }
 0x362   : > { %5345 = vst [vmem:[%s7201_s17 + $0x3c0] sm:$0xff] %v5999_v44  ;;  %5346 = vst [vmem:[%s7201_s17 + $0x3c8] sm:$0xff] %v6000_v45  ;;  %v6001_v50 = vpack.c.bf16 %v2967_v48, %v2965_v46  ;;  %v6002_v51 = vpack.c.bf16 %v3673_v49, %v3671_v47 }
 0x364   : > { %5347 = vst [vmem:[%s7201_s17 + $0x3d0] sm:$0xff] %v6001_v50  ;;  %5348 = vst [vmem:[%s7201_s17 + $0x3d8] sm:$0xff] %v6002_v51 }
 0x366   : > { %v2971_v52 = vpop.f32.mrb[124].mxu0  ;;  %v3677_v53 = vpop.f32.mrb[124].mxu1 }
 0x367   : > { %v2973_v54 = vpop.f32.mrb[125].mxu0  ;;  %v3679_v55 = vpop.f32.mrb[125].mxu1 }
 0x368   : > { %v6003_v56 = vpack.c.bf16 %v2973_v54, %v2971_v52  ;;  %v6004_v57 = vpack.c.bf16 %v3679_v55, %v3677_v53  ;;  %v2975_v58 = vpop.f32.mrb[126].mxu0  ;;  %v3681_v59 = vpop.f32.mrb[126].mxu1 }
 0x369   : > { %v2977_v60 = vpop.f32.mrb[127].mxu0  ;;  %v3683_v61 = vpop.f32.mrb[127].mxu1 }
 0x36a   : > { %5349 = vst [vmem:[%s7201_s17 + $0x3e0] sm:$0xff] %v6003_v56  ;;  %5350 = vst [vmem:[%s7201_s17 + $0x3e8] sm:$0xff] %v6004_v57  ;;  %v6005_v62 = vpack.c.bf16 %v2977_v60, %v2975_v58  ;;  %v6006_v63 = vpack.c.bf16 %v3683_v61, %v3681_v59 }
 0x36c   : > { %5351 = vst [vmem:[%s7201_s17 + $0x3f0] sm:$0xff] %v6005_v62  ;;  %5352 = vst [vmem:[%s7201_s17 + $0x3f8] sm:$0xff] %v6006_v63 }
 0x36d   : > { %6798 = shalt.err (!%p6795_p8)
}
 0x36e   : > { %s6799_s28 = scalar_lea.hbm %s7332_s6, 16384  ;;  %s6803_s18 = scalar_lea.hbm %s7389_s2, 32768 }
 0x36f   : > { %p6800_p0 = scmp.ne.s32.totalorder %s7332_s6, %s6799_s28  ;;  %p6804_p12 = scmp.lt.u32.totalorder %s7332_s6, %s7389_s2 }
 0x370   : > { %p6805_p5 = scmp.lt.u32.totalorder %s6803_s18, %s6799_s28  ;;  %p6807_p9 = scmp.lt.u32.totalorder %s6799_s28, %s7332_s6 }
 0x371   : > { %p6801_p2 = pnand %p6800_p0, %p7408_p11 }
 0x372   : > { %p6806_p10 = por %p6805_p5, %p6804_p12 }
 0x373   : > { %p6802_p7 = pneg %p6801_p2 }
 0x374   : > { %p6808_p13 = por %p6807_p9, %p6806_p10 }
 0x376   : > { %p6809_p4 = pnand %p6808_p13, %p6802_p7 }
 0x378   : > { %6812 = shalt.err (!%p6809_p4)
}
 0x379   : > { %s6879_s8 = smov 256   ;;  %s6880_s17 = smov 512  }
 0x37a   : > { %s6881_s19 = smov 16  }
 0x37b   : > { %6270 = dma.vmem_to_hbm [thread:$0]  (%p7408_p11), %s7334_s22, 16384, %s7332_s6, %s5354_s12, %s6879_s8, %s6880_s17, %s6881_s19  }
 0x37c PF: > { %s5385_s15 = sand.u32 1, %s6851_s9   ;;  %p7409_p1 = scmp.ne.s32.totalorder %s7400_s21, 0 }
 0x37d   : > { %p7410_p3 = scmp.ge.s32.totalorder %s6871_s14, 2  ;;  %s5386_s5 = scalar_lea.sflag [#allocation5], %s5385_s15 }
 0x37f   : > { %p6281_p6 = pnand %p7410_p3, %p7409_p1 }
 0x381   : > { %6846 = dma.done.wait (!%p6281_p6), %s5386_s5, 16384  }
 0x382   : > { %6848 = vsyncadd (!%p6281_p6), %s5386_s5, 4294950912  ;;  %s19_s14 = sadd.s32 1, %s6871_s14   ;;  %s7411_s9 = smov %s6855_s10 }
 0x383   : > { %p16_p8 = scmp.ge.s32.totalorder %s19_s14, 4   ;;  %s7412_s10 = smov %s6859_s11 }
 0x384   : > { %s7413_s11 = smov %s7018_s7  ;;  %s7414_s12 = smov %s6867_s13 }
 0x385   : > { %s7415_s13 = smov %s7417_s27  ;;  %18 = sbr.rel (!%p16_p8) target bundleno = 7 (0x7), region = 87 }
 0x38c   :  { %5391 = vsyncpa [#allocation4], 1 }
 0x38d   :  { %5393 = vsyncpa [#allocation4 + $0x1], 1 }
 0x38e   :  { %5394 = vsyncpa [#allocation7], 1 }
 0x38f   :  { %5396 = vsyncpa [#allocation7 + $0x1], 1 }
 0x390   :  { %5397 = vsyncpa [#allocation5], 1 }
 0x391   :  { %5399 = vsyncpa [#allocation5 + $0x1], 1 }

</bundles_post_ra>
